<compile_context>
chip_gen: v7x
topology: tpu7x:2x2x1
jax: 0.10.0
libtpu: 0.0.40
codegen_flags: <defaults>
</compile_context>

<pallas_src>
import numpy as np
import jax
import jax.numpy as jnp
from jax import lax
from jax.experimental import pallas as pl
from jax.experimental.pallas import tpu as pltpu

LANE = 128


def _round_up(x, m):
    return (x + m - 1) // m * m


def seghead_kernel(xp_ref, w3_ref, bias_ref, w1_ref, o_ref):
    """One batch element per grid step.

    xp_ref  : (1, H+2, W+2, Cp) bf16  spatially zero-padded NHWC, channels padded
    w3_ref  : (9*Cp, Cm)        bf16  3x3 weights, BN scale folded, (dh,dw,cin) rows
    bias_ref: (1, Cm)           f32   folded BN bias (padded cols are 0)
    w1_ref  : (Cm, Co)          bf16  1x1 conv weights (zero-padded)
    o_ref   : (1, H, W, Co)     f32   lane-dense output
    """
    H, W = o_ref.shape[1], o_ref.shape[2]

    # im2col: nine shifted HxW views concatenated along the (lane-aligned,
    # Cp = multiple of 128) channel axis -> (H*W, 9*Cp).  Order matches the
    # (dh, dw, cin) flattening of w3_ref.
    taps = [xp_ref[0, dh:dh + H, dw:dw + W, :]
            for dh in range(3) for dw in range(3)]
    patches = jnp.concatenate(taps, axis=-1).reshape(H * W, -1)

    # 3x3 conv (+ folded BN scale): single bf16 MXU matmul, f32 accumulation.
    acc = jnp.dot(patches, w3_ref[...], preferred_element_type=jnp.float32)

    # Folded BN bias + ReLU (f32 VPU epilogue).
    mid = jnp.maximum(acc + bias_ref[...], 0.0)

    # 1x1 conv: second bf16 MXU matmul, f32 accumulation.
    out = jnp.dot(mid.astype(w1_ref.dtype), w1_ref[...],
                  preferred_element_type=jnp.float32)

    o_ref[...] = out.reshape(1, H, W, -1).astype(o_ref.dtype)


@jax.jit
def seghead_forward(x_nchw, w3_hwio, bn_scale, bn_bias, w1):
    """x_nchw: (B, Cin, H, W) f32.  Returns (B, n_classes, H, W) f32."""
    B, Cin, H, W = x_nchw.shape
    Cmid, NC = w1.shape
    Cp, Cm, Co = (_round_up(c, LANE) for c in (Cin, Cmid, NC))

    # Layout glue as one fused producer: NCHW->NHWC, 1px spatial halo pad,
    # channel pad to lane width, bf16 cast.
    xp = jnp.pad(jnp.transpose(x_nchw, (0, 2, 3, 1)),
                 ((0, 0), (1, 1), (1, 1), (0, Cp - Cin))).astype(jnp.bfloat16)

    # Fold BN scale into the 3x3 weights, pad channels, flatten to (9*Cp, Cm).
    w3f = w3_hwio * bn_scale[None, None, None, :]
    w3f = jnp.pad(w3f, ((0, 0), (0, 0), (0, Cp - Cin), (0, Cm - Cmid)))
    w3_2d = w3f.reshape(9 * Cp, Cm).astype(jnp.bfloat16)
    bias2d = jnp.pad(bn_bias, (0, Cm - Cmid)).reshape(1, Cm).astype(jnp.float32)
    w1p = jnp.pad(w1, ((0, Cm - Cmid), (0, Co - NC))).astype(jnp.bfloat16)

    out_nhwc = pl.pallas_call(
        seghead_kernel,
        out_shape=jax.ShapeDtypeStruct((B, H, W, Co), jnp.float32),
        grid_spec=pltpu.PrefetchScalarGridSpec(
            num_scalar_prefetch=0,
            grid=(B,),
            in_specs=[
                pl.BlockSpec((1, H + 2, W + 2, Cp), lambda b: (b, 0, 0, 0)),
                pl.BlockSpec((9 * Cp, Cm), lambda b: (0, 0)),
                pl.BlockSpec((1, Cm), lambda b: (0, 0)),
                pl.BlockSpec((Cm, Co), lambda b: (0, 0)),
            ],
            out_specs=pl.BlockSpec((1, H, W, Co), lambda b: (b, 0, 0, 0)),
        ),
        compiler_params=pltpu.CompilerParams(
            dimension_semantics=("parallel",)),
    )(xp, w3_2d, bias2d, w1p)

    # Drop channel padding, back to PyTorch's NCHW convention.
    return jnp.transpose(out_nhwc[..., :NC], (0, 3, 1, 2))


# ----------------------------- references -----------------------------------

def _conv_nchw(x, w_hwio, padding):
    return lax.conv_general_dilated(
        x, jnp.transpose(w_hwio, (3, 2, 0, 1)), (1, 1), padding,
        dimension_numbers=("NCHW", "OIHW", "NCHW"),
        precision=lax.Precision.HIGHEST,
        preferred_element_type=jnp.float32)


def reference_forward(x, w3_hwio, bn_scale, bn_bias, w1):
    """Pure-f32 reference: conv3x3 -> BN affine -> ReLU -> conv1x1."""
    y = _conv_nchw(x, w3_hwio, ((1, 1), (1, 1)))
    y = y * bn_scale[None, :, None, None] + bn_bias[None, :, None, None]
    y = jnp.maximum(y, 0.0)
    return _conv_nchw(y, w1[None, None], "VALID")


def quantized_reference(x, w3_hwio, bn_scale, bn_bias, w1):
    """f32 math on the same bf16-rounded operands the kernel consumes."""
    bf = lambda a: a.astype(jnp.bfloat16).astype(jnp.float32)
    w3f = bf(w3_hwio * bn_scale[None, None, None, :])
    y = _conv_nchw(bf(x), w3f, ((1, 1), (1, 1))) + bn_bias[None, :, None, None]
    y = bf(jnp.maximum(y, 0.0))
    return _conv_nchw(y, bf(w1)[None, None], "VALID")


if __name__ == "__main__":
    # Small shapes consistent with SegHead(in_chan=4, mid_chan=8, n_classes=5).
    B, Cin, H, W = 2, 4, 16, 16
    Cmid, NC = 8, 5
    eps = 1e-5

    key = jax.random.PRNGKey(0)
    k_x, k_w3, k_w1, k_g, k_b, k_m, k_v = jax.random.split(key, 7)

    x = jax.random.normal(k_x, (B, Cin, H, W), dtype=jnp.float32)
    w3_hwio = 0.1 * jax.random.normal(k_w3, (3, 3, Cin, Cmid), dtype=jnp.float32)
    w1 = 0.1 * jax.random.normal(k_w1, (Cmid, NC), dtype=jnp.float32)

    # BatchNorm (eval mode) parameters, folded into scale/bias.
    gamma = 1.0 + 0.1 * jax.random.normal(k_g, (Cmid,), dtype=jnp.float32)
    beta = 0.1 * jax.random.normal(k_b, (Cmid,), dtype=jnp.float32)
    running_mean = 0.1 * jax.random.normal(k_m, (Cmid,), dtype=jnp.float32)
    running_var = jnp.abs(jax.random.normal(k_v, (Cmid,), dtype=jnp.float32)) + 0.5
    bn_scale = gamma / jnp.sqrt(running_var + eps)
    bn_bias = beta - running_mean * bn_scale

    out = jax.block_until_ready(seghead_forward(x, w3_hwio, bn_scale, bn_bias, w1))
    assert out.shape == (B, NC, H, W), out.shape

    # Tight check: same bf16-rounded operands, f32 accumulation on both sides.
    ref_q = jax.block_until_ready(
        quantized_reference(x, w3_hwio, bn_scale, bn_bias, w1))
    np.testing.assert_allclose(np.asarray(out), np.asarray(ref_q),
                               rtol=2e-3, atol=2e-3)

    # Loose check against full-f32 module semantics (bf16 storage error only).
    ref = jax.block_until_ready(
        reference_forward(x, w3_hwio, bn_scale, bn_bias, w1))
    np.testing.assert_allclose(np.asarray(out), np.asarray(ref),
                               rtol=3e-2, atol=3e-2)

    print("KERNEL_OK")
</pallas_src>

<mosaic_0001>
module attributes {stable_mosaic.version = 11 : i64} {
  func.func @seghead_kernel(%arg0: i32, %arg1: memref<1x18x18x128xbf16, #tpu.memory_space<vmem>>, %arg2: memref<1152x128xbf16, #tpu.memory_space<vmem>>, %arg3: memref<1x128xf32, #tpu.memory_space<vmem>>, %arg4: memref<128x128xbf16, #tpu.memory_space<vmem>>, %arg5: memref<1x16x16x128xf32, #tpu.memory_space<vmem>>) attributes {dimension_semantics = [#tpu.dimension_semantics<parallel>], iteration_bounds = array<i64: 2>, scalar_prefetch = 0 : i64, scratch_operands = 0 : i64, tpu.core_type = #tpu.core_type<tc>, window_params = [{transform_indices = @transform_0, window_bounds = array<i64: 1, 18, 18, 128>}, {pipeline_mode = #tpu.pipeline_mode<synchronous>, transform_indices = @transform_1, window_bounds = array<i64: 1152, 128>}, {pipeline_mode = #tpu.pipeline_mode<synchronous>, transform_indices = @transform_2, window_bounds = array<i64: 1, 128>}, {pipeline_mode = #tpu.pipeline_mode<synchronous>, transform_indices = @transform_3, window_bounds = array<i64: 128, 128>}, {transform_indices = @transform_4, window_bounds = array<i64: 1, 16, 16, 128>}]} {
    %c0 = arith.constant 0 : index
    %c0_0 = arith.constant 0 : index
    %c0_1 = arith.constant 0 : index
    %c0_2 = arith.constant 0 : index
    %0 = vector.load %arg1[%c0, %c0_0, %c0_1, %c0_2] : memref<1x18x18x128xbf16, #tpu.memory_space<vmem>>, vector<1x16x16x128xbf16>
    %1 = vector.shape_cast %0 : vector<1x16x16x128xbf16> to vector<16x16x128xbf16>
    %c0_3 = arith.constant 0 : index
    %c0_4 = arith.constant 0 : index
    %c1 = arith.constant 1 : index
    %c0_5 = arith.constant 0 : index
    %2 = vector.load %arg1[%c0_3, %c0_4, %c1, %c0_5] : memref<1x18x18x128xbf16, #tpu.memory_space<vmem>>, vector<1x16x16x128xbf16>
    %3 = vector.shape_cast %2 : vector<1x16x16x128xbf16> to vector<16x16x128xbf16>
    %c0_6 = arith.constant 0 : index
    %c0_7 = arith.constant 0 : index
    %c2 = arith.constant 2 : index
    %c0_8 = arith.constant 0 : index
    %4 = vector.load %arg1[%c0_6, %c0_7, %c2, %c0_8] : memref<1x18x18x128xbf16, #tpu.memory_space<vmem>>, vector<1x16x16x128xbf16>
    %5 = vector.shape_cast %4 : vector<1x16x16x128xbf16> to vector<16x16x128xbf16>
    %c0_9 = arith.constant 0 : index
    %c1_10 = arith.constant 1 : index
    %c0_11 = arith.constant 0 : index
    %c0_12 = arith.constant 0 : index
    %6 = vector.load %arg1[%c0_9, %c1_10, %c0_11, %c0_12] : memref<1x18x18x128xbf16, #tpu.memory_space<vmem>>, vector<1x16x16x128xbf16>
    %7 = vector.shape_cast %6 : vector<1x16x16x128xbf16> to vector<16x16x128xbf16>
    %c0_13 = arith.constant 0 : index
    %c1_14 = arith.constant 1 : index
    %c1_15 = arith.constant 1 : index
    %c0_16 = arith.constant 0 : index
    %8 = vector.load %arg1[%c0_13, %c1_14, %c1_15, %c0_16] : memref<1x18x18x128xbf16, #tpu.memory_space<vmem>>, vector<1x16x16x128xbf16>
    %9 = vector.shape_cast %8 : vector<1x16x16x128xbf16> to vector<16x16x128xbf16>
    %c0_17 = arith.constant 0 : index
    %c1_18 = arith.constant 1 : index
    %c2_19 = arith.constant 2 : index
    %c0_20 = arith.constant 0 : index
    %10 = vector.load %arg1[%c0_17, %c1_18, %c2_19, %c0_20] : memref<1x18x18x128xbf16, #tpu.memory_space<vmem>>, vector<1x16x16x128xbf16>
    %11 = vector.shape_cast %10 : vector<1x16x16x128xbf16> to vector<16x16x128xbf16>
    %c0_21 = arith.constant 0 : index
    %c2_22 = arith.constant 2 : index
    %c0_23 = arith.constant 0 : index
    %c0_24 = arith.constant 0 : index
    %12 = vector.load %arg1[%c0_21, %c2_22, %c0_23, %c0_24] : memref<1x18x18x128xbf16, #tpu.memory_space<vmem>>, vector<1x16x16x128xbf16>
    %13 = vector.shape_cast %12 : vector<1x16x16x128xbf16> to vector<16x16x128xbf16>
    %c0_25 = arith.constant 0 : index
    %c2_26 = arith.constant 2 : index
    %c1_27 = arith.constant 1 : index
    %c0_28 = arith.constant 0 : index
    %14 = vector.load %arg1[%c0_25, %c2_26, %c1_27, %c0_28] : memref<1x18x18x128xbf16, #tpu.memory_space<vmem>>, vector<1x16x16x128xbf16>
    %15 = vector.shape_cast %14 : vector<1x16x16x128xbf16> to vector<16x16x128xbf16>
    %c0_29 = arith.constant 0 : index
    %c2_30 = arith.constant 2 : index
    %c2_31 = arith.constant 2 : index
    %c0_32 = arith.constant 0 : index
    %16 = vector.load %arg1[%c0_29, %c2_30, %c2_31, %c0_32] : memref<1x18x18x128xbf16, #tpu.memory_space<vmem>>, vector<1x16x16x128xbf16>
    %17 = vector.shape_cast %16 : vector<1x16x16x128xbf16> to vector<16x16x128xbf16>
    %18 = tpu.concatenate %1, %3, %5, %7, %9, %11, %13, %15, %17 in 2 : vector<16x16x128xbf16>, vector<16x16x128xbf16>, vector<16x16x128xbf16>, vector<16x16x128xbf16>, vector<16x16x128xbf16>, vector<16x16x128xbf16>, vector<16x16x128xbf16>, vector<16x16x128xbf16>, vector<16x16x128xbf16> -> vector<16x16x1152xbf16>
    %19 = vector.shape_cast %18 : vector<16x16x1152xbf16> to vector<256x1152xbf16>
    %c0_33 = arith.constant 0 : index
    %c0_34 = arith.constant 0 : index
    %20 = vector.load %arg2[%c0_33, %c0_34] : memref<1152x128xbf16, #tpu.memory_space<vmem>>, vector<1152x128xbf16>
    %cst = arith.constant dense<0.000000e+00> : vector<256x128xf32>
    %21 = tpu.matmul %19, %20, %cst {dimension_numbers = #tpu.dot_dimension_numbers<[1], [0], [0], [1], [0, 0, 1, 1], [], []>} : vector<256x1152xbf16>, vector<1152x128xbf16>, vector<256x128xf32> -> vector<256x128xf32>
    %c0_35 = arith.constant 0 : index
    %c0_36 = arith.constant 0 : index
    %22 = vector.load %arg3[%c0_35, %c0_36] : memref<1x128xf32, #tpu.memory_space<vmem>>, vector<1x128xf32>
    %23 = vector.broadcast %22 : vector<1x128xf32> to vector<256x128xf32>
    %24 = arith.addf %21, %23 : vector<256x128xf32>
    %cst_37 = arith.constant 0.000000e+00 : f32
    %25 = vector.broadcast %cst_37 : f32 to vector<256x128xf32>
    %26 = arith.maximumf %24, %25 : vector<256x128xf32>
    %27 = arith.truncf %26 : vector<256x128xf32> to vector<256x128xbf16>
    %c0_38 = arith.constant 0 : index
    %c0_39 = arith.constant 0 : index
    %28 = vector.load %arg4[%c0_38, %c0_39] : memref<128x128xbf16, #tpu.memory_space<vmem>>, vector<128x128xbf16>
    %cst_40 = arith.constant dense<0.000000e+00> : vector<256x128xf32>
    %29 = tpu.matmul %27, %28, %cst_40 {dimension_numbers = #tpu.dot_dimension_numbers<[1], [0], [0], [1], [0, 0, 1, 1], [], []>} : vector<256x128xbf16>, vector<128x128xbf16>, vector<256x128xf32> -> vector<256x128xf32>
    %30 = vector.shape_cast %29 : vector<256x128xf32> to vector<1x16x16x128xf32>
    %c0_41 = arith.constant 0 : index
    %c0_42 = arith.constant 0 : index
    %c0_43 = arith.constant 0 : index
    %c0_44 = arith.constant 0 : index
    %31 = vector.load %arg5[%c0_41, %c0_42, %c0_43, %c0_44] : memref<1x16x16x128xf32, #tpu.memory_space<vmem>>, vector<1x16x16x128xf32>
    tpu.vector_store %arg5[%c0_41, %c0_42, %c0_43, %c0_44], %30 {strides = array<i32>} : memref<1x16x16x128xf32, #tpu.memory_space<vmem>>, vector<1x16x16x128xf32>,
    return
  }
  func.func @transform_0(%arg0: i32) -> (i32, i32, i32, i32) {
    %c0_i32 = arith.constant 0 : i32
    %c0_i32_0 = arith.constant 0 : i32
    %c0_i32_1 = arith.constant 0 : i32
    %c0_i32_2 = arith.constant 0 : i32
    return %arg0, %c0_i32, %c0_i32_0, %c0_i32_1 : i32, i32, i32, i32
  }
  func.func @transform_1(%arg0: i32) -> (i32, i32) {
    %c0_i32 = arith.constant 0 : i32
    %c0_i32_0 = arith.constant 0 : i32
    %c0_i32_1 = arith.constant 0 : i32
    return %c0_i32, %c0_i32_0 : i32, i32
  }
  func.func @transform_2(%arg0: i32) -> (i32, i32) {
    %c0_i32 = arith.constant 0 : i32
    %c0_i32_0 = arith.constant 0 : i32
    %c0_i32_1 = arith.constant 0 : i32
    return %c0_i32, %c0_i32_0 : i32, i32
  }
  func.func @transform_3(%arg0: i32) -> (i32, i32) {
    %c0_i32 = arith.constant 0 : i32
    %c0_i32_0 = arith.constant 0 : i32
    %c0_i32_1 = arith.constant 0 : i32
    return %c0_i32, %c0_i32_0 : i32, i32
  }
  func.func @transform_4(%arg0: i32) -> (i32, i32, i32, i32) {
    %c0_i32 = arith.constant 0 : i32
    %c0_i32_0 = arith.constant 0 : i32
    %c0_i32_1 = arith.constant 0 : i32
    %c0_i32_2 = arith.constant 0 : i32
    return %arg0, %c0_i32, %c0_i32_0, %c0_i32_1 : i32, i32, i32, i32
  }
}

</mosaic_0001>

<bundles_post_ra>
// kernel: seghead_forward.1
= control target key start
LH: loop header
LB: loop body
LE: loop exit
PB: predicated region body
PF: predicated region fallthrough
CT: control target
= control target key end

     0   :  { %s4774_s15 = smov 0   ;;  %s6113_s0 = inlined_call_operand.vmem [shape: bf16[2,18,18,128], index: 0, kind: input, shape index: {}]   ;;  %s6114_s1 = inlined_call_operand.vmem [shape: bf16[1152,128], index: 1, kind: input, shape index: {}]   ;;  %s6115_s2 = inlined_call_operand.vmem [shape: f32[1,128], index: 2, kind: input, shape index: {}]   ;;  %s6116_s3 = inlined_call_operand.vmem [shape: bf16[128,128], index: 3, kind: input, shape index: {}]   ;;  %s6117_s4 = inlined_call_operand.vmem [shape: f32[2,16,16,128], index: 4, kind: output, shape index: {}]  }
   0x1 LB: > { %s3535_s16 = sadd.s32 4294967295, %s4747_s15   ;;  %p3539_p0 = scmp.ge.s32.totalorder %s4747_s15, 1  ;;  %s4747_s15 = sphi %s4774_s15, %s14_s15  }
   0x2   : > { %p162_p1 = scmp.lt.s32.totalorder %s4747_s15, 3 }
   0x4   : > { %p163_p2 = pnand %p3539_p0, %p162_p1 }
   0x5   : > { %v4500_v0 = vld [vmem:[%s6114_s1 + $0x40] sm:$0xff] (!%p163_p2)   ;;  %v4504_v4 = vld [vmem:[%s6114_s1 + $0x48] sm:$0xff] (!%p163_p2)   ;;  %v4508_v8 = vld [vmem:[%s6114_s1 + $0x50] sm:$0xff] (!%p163_p2)   ;;  %p188_p3 = scmp.lt.s32.totalorder (!%p163_p2), %s3535_s16, 1  ;;  %vm537_vm0 = vsmask.f32 (!%p163_p2), 7424 }
   0x6   : > { %166 = sbr.rel (%p163_p2) target bundleno = 788 (0x314), region = 36  ;;  %v4501_v1 = vld [vmem:[%s6114_s1] sm:$0xff] (!%p163_p2)   ;;  %3899 = vmatprep.subr.bf16.mxu0 (!%p163_p2), %v4500_v0  ;;  %v4505_v5 = vld [vmem:[%s6114_s1 + $0x8] sm:$0xff] (!%p163_p2)   ;;  %v4509_v9 = vld [vmem:[%s6114_s1 + $0x10] sm:$0xff] (!%p163_p2)   ;;  %vm794_vm1 = vcmask (!%p163_p2), 1046528  }
   0x7   : > { %v4502_v2 = vld [vmem:[%s6114_s1 + $0xc0] sm:$0xff] (!%p163_p2)   ;;  %3900 = vmatpush3.bf16.msra.mxu0 (!%p163_p2), %v4501_v1  ;;  %v4506_v6 = vld [vmem:[%s6114_s1 + $0xc8] sm:$0xff] (!%p163_p2)   ;;  %v4510_v10 = vld [vmem:[%s6114_s1 + $0xd0] sm:$0xff] (!%p163_p2)  }
   0x8   : > { %v4503_v3 = vld [vmem:[%s6114_s1 + $0x80] sm:$0xff] (!%p163_p2)   ;;  %4011 = vmatprep.subr.bf16.mxu1 (!%p163_p2), %v4502_v2  ;;  %3901 = vmatprep.subr.bf16.mxu0 (!%p163_p2), %v4504_v4  ;;  %v4507_v7 = vld [vmem:[%s6114_s1 + $0x88] sm:$0xff] (!%p163_p2)   ;;  %v4511_v11 = vld [vmem:[%s6114_s1 + $0x90] sm:$0xff] (!%p163_p2)  }
   0x9   : > { %4012 = vmatpush3.bf16.msra.mxu1 (!%p163_p2), %v4503_v3  ;;  %v4512_v12 = vld [vmem:[%s6114_s1 + $0x58] sm:$0xff] (!%p163_p2)   ;;  %v4516_v16 = vld [vmem:[%s6114_s1 + $0x60] sm:$0xff] (!%p163_p2)   ;;  %v4520_v20 = vld [vmem:[%s6114_s1 + $0x68] sm:$0xff] (!%p163_p2)  }
   0xa   : > { %4013 = vmatprep.subr.bf16.mxu1 (!%p163_p2), %v4506_v6  ;;  %v4513_v13 = vld [vmem:[%s6114_s1 + $0x18] sm:$0xff] (!%p163_p2)   ;;  %v4517_v17 = vld [vmem:[%s6114_s1 + $0x20] sm:$0xff] (!%p163_p2)   ;;  %v4521_v21 = vld [vmem:[%s6114_s1 + $0x28] sm:$0xff] (!%p163_p2)  }
   0xb   : > { %3902 = vmatpush3.bf16.msra.mxu0 (!%p163_p2), %v4505_v5  ;;  %v4514_v14 = vld [vmem:[%s6114_s1 + $0xd8] sm:$0xff] (!%p163_p2)   ;;  %v4518_v18 = vld [vmem:[%s6114_s1 + $0xe0] sm:$0xff] (!%p163_p2)   ;;  %v4522_v22 = vld [vmem:[%s6114_s1 + $0xe8] sm:$0xff] (!%p163_p2)  }
   0xc   : > { %3903 = vmatprep.subr.bf16.mxu0 (!%p163_p2), %v4508_v8  ;;  %v4515_v15 = vld [vmem:[%s6114_s1 + $0x98] sm:$0xff] (!%p163_p2)   ;;  %v4519_v19 = vld [vmem:[%s6114_s1 + $0xa0] sm:$0xff] (!%p163_p2)   ;;  %v4523_v23 = vld [vmem:[%s6114_s1 + $0xa8] sm:$0xff] (!%p163_p2)  }
   0xd   : > { %4014 = vmatpush3.bf16.msra.mxu1 %v4507_v7  ;;  %s6120_s16 = smov (!%p188_p3, %s3535_s16), 1  ;;  %v4524_v24 = vld [vmem:[%s6114_s1 + $0x70] sm:$0xff]   ;;  %v4528_v28 = vld [vmem:[%s6114_s1 + $0x78] sm:$0xff]   ;;  %v4534_v39 = vld [vmem:[%s6114_s1 + $0x140] sm:$0xff]  }
   0xe   : > { %4015 = vmatprep.subr.bf16.mxu1 %v4510_v10  ;;  %s4491_s19 = smul.u32 216, %s6120_s16  ;;  %v4525_v25 = vld [vmem:[%s6114_s1 + $0x30] sm:$0xff]   ;;  %v4529_v29 = vld [vmem:[%s6114_s1 + $0x38] sm:$0xff]   ;;  %v4537_v51 = vld [vmem:[%s6114_s1 + $0x100] sm:$0xff]   ;;  %s3898_s18 = sshll.u32 %s6120_s16, 8 }
   0xf   : > { %3904 = vmatpush3.bf16.msra.mxu0 %v4509_v9  ;;  %v4526_v26 = vld [vmem:[%s6114_s1 + $0xf0] sm:$0xff]   ;;  %v4530_v30 = vld [vmem:[%s6114_s1 + $0xf8] sm:$0xff]   ;;  %v4546_v58 = vld [vmem:[%s6114_s1 + $0x148] sm:$0xff]   ;;  %s6076_s21 = scalar_lea.vmem %s6117_s4, %s3898_s18 }
  0x10   : > { %3905 = vmatprep.subr.bf16.mxu0 %v4512_v12  ;;  %v4527_v27 = vld [vmem:[%s6114_s1 + $0xb0] sm:$0xff]   ;;  %s4879_s30 = scalar_lea.vmem %s6113_s0, %s4491_s19  ;;  %v4533_v35 = vld [vmem:[%s6114_s1 + $0xb8] sm:$0xff]   ;;  %v4549_v4 = vld [vmem:[%s6114_s1 + $0x108] sm:$0xff]  }
  0x11   : > { %4016 = vmatpush3.bf16.msra.mxu1 %v4511_v11  ;;  %v199_v31 = vld [vmem:[%s4879_s30] sm:$0xf]  ;;  %v200_v32 = vld [vmem:[%s4879_s30 + $0x4] sm:$0xf]  ;;  %v3543_v40 = vld [vmem:[%s4879_s30 + $0xc] sm:$0xf] }
  0x12   : > { %4017 = vmatprep.subr.bf16.mxu1 %v4514_v14  ;;  %v3671_v33 = vcombine.low %v199_v31, %v200_v32  ;;  %v4532_v34 = vld [vmem:[%s4879_s30 + $0x8] ss:$0 sps:$4 sm:$0x11]   ;;  %v3544_v41 = vld [vmem:[%s4879_s30 + $0x10] sm:$0xf] }
  0x13   : > { %3906 = vmatpush3.bf16.msra.mxu0 %v4513_v13  ;;  %v546_v38 = vshll.u32 %v4532_v34, 16  ;;  %v4898_v44 = vcombine.low %v3543_v40, %v3544_v41  ;;  %v247_v45 = vld [vmem:[%s4879_s30] sm:$0xe]  ;;  %v201_v46 = vld [vmem:[%s4879_s30 + $0xc] sm:$0xf]  ;;  %v796_v49 = vrot.slane %v4532_v34, 1 }
  0x14   : > { %3907 = vmatprep.subr.bf16.mxu0 %v4516_v16  ;;  %v539_v36 = vshrl.u32 %v3671_v33, 16  ;;  %v541_v37 = vshll.u32 %v3671_v33, 16  ;;  %v3703_v48 = vcombine.low %v247_v45, %v200_v32  ;;  %v202_v50 = vld [vmem:[%s4879_s30 + $0x10] sm:$0xf]  ;;  %v3545_v54 = vld [vmem:[%s4879_s30 + $0x18] sm:$0xf] }
  0x15   : > { %4018 = vmatpush3.bf16.msra.mxu1 %v4515_v15  ;;  %v548_v43 = vrot.slane %v546_v38, 1  ;;  %2563 = vmatprep.mubr.bf16.mxu1 %v4898_v44  ;;  %v3672_v52 = vcombine.low %v201_v46, %v202_v50  ;;  %v4540_v53 = vld [vmem:[%s4879_s30 + $0x14] ss:$0 sps:$4 sm:$0x11]   ;;  %v3546_v57 = vld [vmem:[%s4879_s30 + $0x1c] sm:$0xf] }
  0x16   : > { %4019 = vmatprep.subr.bf16.mxu1 %v4518_v18  ;;  %v543_v42 = vrot.slane %v541_v37, 1  ;;  %v795_v56 = vrot.slane %v3703_v48, 1  ;;  %v558_v61 = vshll.u32 %v4540_v53, 16  ;;  %v4914_v62 = vcombine.low %v3545_v54, %v3546_v57  ;;  %v248_v63 = vld [vmem:[%s4879_s30 + $0xc] sm:$0xe]  ;;  %v4558_v9 = vld [vmem:[%s6114_s1 + $0x150] sm:$0xff]  }
  0x17   : > { %3908 = vmatpush3.bf16.msra.mxu0 %v4517_v17  ;;  %v551_v59 = vshrl.u32 %v3672_v52, 16  ;;  %v553_v60 = vshll.u32 %v3672_v52, 16  ;;  %v3704_v1 = vcombine.low %v248_v63, %v202_v50  ;;  %v203_v2 = vld [vmem:[%s4879_s30 + $0x18] sm:$0xf]  ;;  %v204_v3 = vld [vmem:[%s4879_s30 + $0x1c] sm:$0xf] }
  0x18   : > { %3909 = vmatprep.subr.bf16.mxu0 %v4520_v20  ;;  %v544_v47 = vor.u32 %v543_v42, %v539_v36  ;;  %v797_v0 = vsel %vm794_vm1, %v795_v56, %v796_v49  ;;  %v560_v6 = vrot.slane %v558_v61, 1  ;;  %v799_v7 = vrot.slane %v4540_v53, 1  ;;  %v4545_v11 = vld [vmem:[%s4879_s30 + $0x20] ss:$0 sps:$4 sm:$0x11]   ;;  %v4561_v20 = vld [vmem:[%s6114_s1 + $0x110] sm:$0xff]  }
  0x19   : > { %4020 = vmatpush3.bf16.msra.mxu1 %v4519_v19  ;;  %v555_v5 = vrot.slane %v553_v60, 1  ;;  %v4923_v8 = vcombine.low %v203_v2, %v204_v3  ;;  %v798_v10 = vrot.slane %v3704_v1, 1  ;;  %v3547_v15 = vld [vmem:[%s4879_s30 + $0x24] sm:$0xf]  ;;  %v570_v16 = vshll.u32 %v4545_v11, 16  ;;  %v4594_v48 = vld [vmem:[%s6114_s1 + $0x1c8] sm:$0xff]  }
  0x1a   : > { %4021 = vmatprep.subr.bf16.mxu1 %v4522_v22  ;;  %v549_v55 = vsel %vm537_vm0, %v544_v47, %v548_v43  ;;  %v3548_v17 = vld [vmem:[%s4879_s30 + $0x28] sm:$0xf]  ;;  %v802_v31 = vrot.slane %v4545_v11, 1  ;;  %v4581_v34 = vld [vmem:[%s6114_s1 + $0x180] sm:$0xff]   ;;  %v3549_v37 = vld [vmem:[%s4879_s30 + $0x30] sm:$0xf] }
  0x1b   : > { %3910 = vmatpush3.bf16.msra.mxu0 %v4521_v21  ;;  %2402 = vmatprep.mubr.bf16.mxu0 %v549_v55  ;;  %v556_v12 = vor.u32 %v555_v5, %v551_v59  ;;  %v563_v13 = vshrl.u32 %v4923_v8, 16  ;;  %v565_v14 = vshll.u32 %v4923_v8, 16  ;;  %v800_v21 = vsel %vm794_vm1, %v798_v10, %v799_v7  ;;  %v3550_v38 = vld [vmem:[%s4879_s30 + $0x34] sm:$0xf]  ;;  %v250_v43 = vld [vmem:[%s4879_s30 + $0x24] sm:$0xe] }
  0x1c   : > { %3911 = vmatprep.subr.bf16.mxu0 %v4524_v24  ;;  %v572_v22 = vrot.slane %v570_v16, 1  ;;  %v249_v24 = vld [vmem:[%s4879_s30 + $0x18] sm:$0xe]  ;;  %v4584_v45 = vld [vmem:[%s6114_s1 + $0x160] sm:$0xff]   ;;  %v207_v46 = vld [vmem:[%s4879_s30 + $0x30] sm:$0xf]  ;;  %v4985_v53 = vcombine.low %v3549_v37, %v3550_v38 }
  0x1d   : > { %4022 = vmatpush3.bf16.msra.mxu1 %v4523_v23  ;;  %v561_v18 = vsel %vm537_vm0, %v556_v12, %v560_v6  ;;  %v567_v19 = vrot.slane %v565_v14, 1  ;;  %v4939_v23 = vcombine.low %v3547_v15, %v3548_v17  ;;  %v4974_v47 = vld [vmem:[%s4879_s30 + $0x34] sm:$0xf]  ;;  %v4988_v55 = vld [vmem:[%s4879_s30 + $0x38] ss:$0 sps:$4 sm:$0x11]  }
  0x1e   : > { %4023 = vmatprep.subr.bf16.mxu1 %v4526_v26  ;;  %v4570_v26 = vld [vmem:[%s6114_s1 + $0x158] sm:$0xff]   ;;  %v4587_v60 = vld [vmem:[%s6114_s1 + $0x120] sm:$0xff]   ;;  %v594_v63 = vshll.u32 %v4988_v55, 16  ;;  %v4598_v2 = vld [vmem:[%s6114_s1 + $0x168] sm:$0xff]  }
  0x1f   : > { %3912 = vmatpush3.bf16.msra.mxu0 %v4525_v25  ;;  %v205_v25 = vld [vmem:[%s4879_s30 + $0x24] sm:$0xf]  ;;  %v251_v5 = vld [vmem:[%s4879_s30 + $0x30] sm:$0xe]  ;;  %v209_v6 = vld [vmem:[%s4879_s30 + $0x3c] sm:$0xf] }
  0x20   : > { %3913 = vmatprep.subr.bf16.mxu0 %v4528_v28  ;;  %v3705_v28 = vcombine.low %v249_v24, %v204_v3  ;;  %v4601_v7 = vld [vmem:[%s6114_s1 + $0x128] sm:$0xff]   ;;  %v5011_v10 = vld [vmem:[%s4879_s30 + $0x40] sm:$0xf]  ;;  %v4608_v11 = vld [vmem:[%s6114_s1 + $0x1d0] sm:$0xff]   ;;  %v3707_v17 = vcombine.low %v251_v5, %v4974_v47 }
  0x21   : > { %4024 = vmatpush3.bf16.msra.mxu1 %v4527_v27  ;;  %v568_v27 = vor.u32 %v567_v19, %v563_v13  ;;  %v3552_v12 = vld [vmem:[%s4879_s30 + $0x40] sm:$0xf]  ;;  %v5018_v13 = vcombine.low %v209_v6, %v5011_v10  ;;  %v5021_v14 = vld [vmem:[%s4879_s30 + $0x44] ss:$0 sps:$4 sm:$0x11]   ;;  %v4609_v15 = vld [vmem:[%s6114_s1 + $0x190] sm:$0xff]  }
  0x22   : > { %4025 = vmatprep.subr.bf16.mxu1 %v4530_v30  ;;  %v4580_v30 = vld [vmem:[%s6114_s1 + $0x1c0] sm:$0xff]   ;;  %v801_v36 = vrot.slane %v3705_v28, 1  ;;  %v4612_v16 = vld [vmem:[%s6114_s1 + $0x170] sm:$0xff]   ;;  %v4622_v28 = vld [vmem:[%s6114_s1 + $0x1d8] sm:$0xff]  }
  0x23   : > { %3914 = vmatpush3.bf16.msra.mxu0 %v4529_v29  ;;  %v206_v29 = vld [vmem:[%s4879_s30 + $0x28] sm:$0xf]  ;;  %v601_v19 = vshll.u32 %v5018_v13, 16  ;;  %v215_v6 = vld [vmem:[%s4879_s30 + $0x60] sm:$0xf] }
  0x24   : > { %4123 = vmatprep.subr.bf16.mxu0 %v4534_v39  ;;  %v4950_v32 = vcombine.low %v205_v25, %v206_v29  ;;  %v4573_v39 = vld [vmem:[%s6114_s1 + $0x118] sm:$0xff]   ;;  %v3706_v54 = vcombine.low %v250_v43, %v206_v29  ;;  %v803_v56 = vsel %vm794_vm1, %v801_v36, %v802_v31  ;;  %v606_v25 = vshll.u32 %v5021_v14, 16  ;;  %v5057_v36 = vld [vmem:[%s4879_s30 + $0x50] ss:$0 sps:$4 sm:$0x11]  }
  0x25   : > { %4026 = vmatpush3.bf16.msra.mxu1 %v4533_v35  ;;  %v573_v35 = vsel %vm537_vm0, %v568_v27, %v572_v22  ;;  %v5042_v27 = vld [vmem:[%s4879_s30 + $0x4c] sm:$0xf]  ;;  %v603_v29 = vrot.slane %v601_v19, 1  ;;  %v4623_v31 = vld [vmem:[%s6114_s1 + $0x198] sm:$0xff]   ;;  %v213_v43 = vld [vmem:[%s4879_s30 + $0x54] sm:$0xf] }
  0x26   : > { %2403 = vmatmul.mubr.bf16.vlgmr.msra.gmra.mrb[0].mxu0 %v3671_v33  ;;  %v4953_v33 = vld [vmem:[%s4879_s30 + $0x2c] ss:$0 sps:$4 sm:$0x11]   ;;  %v575_v40 = vshrl.u32 %v4950_v32, 16  ;;  %v577_v41 = vshll.u32 %v4950_v32, 16  ;;  %4235 = vmatprep.subr.bf16.mxu1 %v4580_v30  ;;  %v804_v3 = vrot.slane %v3706_v54, 1 }
  0x27   : > { %4124 = vmatpush3.bf16.msra.mxu0 %v4537_v51  ;;  %2410 = vmatprep.mubr.bf16.mxu0 %v561_v18  ;;  %v582_v42 = vshll.u32 %v4953_v33, 16  ;;  %v4980_v51 = vcombine.low %v207_v46, %v4974_v47  ;;  %v805_v61 = vrot.slane %v4953_v33, 1  ;;  %v599_v18 = vshrl.u32 %v5018_v13, 16 }
  0x28   : > { %2564 = vmatmul.mubr.bf16.vlgmr.msra.gmra.mrb[0].mxu1 %v797_v0  ;;  %4125 = vmatprep.subr.bf16.mxu0 %v4546_v58  ;;  %v579_v49 = vrot.slane %v577_v41, 1  ;;  %v808_v33 = vrot.slane %v4988_v55, 1  ;;  %v608_v38 = vrot.slane %v606_v25, 1  ;;  %v4626_v41 = vld [vmem:[%s6114_s1 + $0x178] sm:$0xff]   ;;  %v814_v19 = vrot.slane %v5057_v36, 1 }
  0x29   : > { %2571 = vmatprep.mubr.bf16.mxu1 %v4914_v62  ;;  %v584_v50 = vrot.slane %v582_v42, 1  ;;  %4236 = vmatpush3.bf16.msra.mxu1 %v4581_v34  ;;  %v587_v58 = vshrl.u32 %v4980_v51, 16  ;;  %v589_v59 = vshll.u32 %v4980_v51, 16  ;;  %v252_v34 = vld [vmem:[%s4879_s30 + $0x3c] sm:$0xe]  ;;  %v604_v37 = vor.u32 %v603_v29, %v599_v18 }
  0x2a   : > { %4237 = vmatprep.subr.bf16.mxu1 %v4594_v48  ;;  %v580_v57 = vor.u32 %v579_v49, %v575_v40  ;;  %v5062_v40 = vld [vmem:[%s4879_s30 + $0x4c] sm:$0xf]  ;;  %v3708_v42 = vcombine.low %v252_v34, %v5011_v10  ;;  %v618_v48 = vshll.u32 %v5057_v36, 16  ;;  %v5079_v49 = vld [vmem:[%s4879_s30 + $0x58] sm:$0xf] }
  0x2b   : > { %4126 = vmatpush3.bf16.msra.mxu0 %v4549_v4  ;;  %v591_v1 = vrot.slane %v589_v59, 1  ;;  %v3551_v4 = vld [vmem:[%s4879_s30 + $0x3c] sm:$0xf]  ;;  %v4633_v59 = vld [vmem:[%s6114_s1 + $0x1e8] sm:$0xff]   ;;  %v254_v29 = vld [vmem:[%s4879_s30 + $0x54] sm:$0xe] }
  0x2c   : > { %4127 = vmatprep.subr.bf16.mxu0 %v4558_v9  ;;  %v585_v0 = vsel %vm537_vm0, %v580_v57, %v584_v50  ;;  %v596_v9 = vrot.slane %v594_v63, 1  ;;  %v5037_v24 = vcombine.low %v3551_v4, %v3552_v12  ;;  %v4631_v50 = vld [vmem:[%s6114_s1 + $0x1e0] sm:$0xff]   ;;  %v3556_v63 = vld [vmem:[%s4879_s30 + $0x58] sm:$0xf]  ;;  %v218_v34 = vld [vmem:[%s4879_s30 + $0x70] sm:$0xf]  ;;  %v3710_v36 = vcombine.low %v254_v29, %v5079_v49 }
  0x2d   : > { %v4632_v57 = vld [vmem:[%s6114_s1 + $0x1a0] sm:$0xff]   ;;  %v5108_v4 = vld [vmem:[%s4879_s30 + $0x5c] ss:$0 sps:$4 sm:$0x11]  }
  0x2e   : > { %2411 = vmatmul.mubr.bf16.gmra.mrb[4].mxu0 %v3672_v52  ;;  %v4595_v52 = vld [vmem:[%s6114_s1 + $0x188] sm:$0xff]   ;;  %v4642_v18 = vld [vmem:[%s6114_s1 + $0x1f8] sm:$0xff]  }
  0x2f   : > { %4128 = vmatpush3.bf16.msra.mxu0 %v4561_v20  ;;  %2418 = vmatprep.mubr.bf16.mxu0 %v573_v35  ;;  %v4615_v20 = vld [vmem:[%s6114_s1 + $0x130] sm:$0xff]   ;;  %v807_v35 = vrot.slane %v3707_v17, 1  ;;  %v630_v17 = vshll.u32 %v5108_v4, 16  ;;  %v4583_v25 = vld [vmem:[%s4879_s30 + $0x68] ss:$0 sps:$4 sm:$0x11]  }
  0x30   : > { %2572 = vmatmul.mubr.bf16.gmra.mrb[4].mxu1 %v800_v21  ;;  %4129 = vmatprep.subr.bf16.mxu0 %v4570_v26  ;;  %v806_v21 = vsel %vm794_vm1, %v804_v3, %v805_v61  ;;  %v211_v26 = vld [vmem:[%s4879_s30 + $0x48] sm:$0xf]  ;;  %v3555_v61 = vld [vmem:[%s4879_s30 + $0x54] sm:$0xf] }
  0x31   : > { %2579 = vmatprep.mubr.bf16.mxu1 %v4939_v23  ;;  %4238 = vmatpush3.bf16.msra.mxu1 %v4595_v52  ;;  %v5048_v30 = vcombine.low %v211_v26, %v5042_v27  ;;  %v809_v46 = vsel %vm794_vm1, %v807_v35, %v808_v33  ;;  %v609_v52 = vsel %vm537_vm0, %v604_v37, %v608_v38  ;;  %v4640_v3 = vld [vmem:[%s6114_s1 + $0x1f0] sm:$0xff]   ;;  %v217_v33 = vld [vmem:[%s4879_s30 + $0x6c] sm:$0xf]  ;;  %v642_v38 = vshll.u32 %v4583_v25, 16 }
  0x32   : > { %4239 = vmatprep.subr.bf16.mxu1 %v4608_v11  ;;  %v5119_v10 = vcombine.low %v3555_v61, %v3556_v63  ;;  %v4604_v29 = vld [vmem:[%s4879_s30 + $0x8c] ss:$0 sps:$4 sm:$0x11]  }
  0x33   : > { %4130 = vmatpush3.bf16.msra.mxu0 %v4573_v39  ;;  %v3553_v39 = vld [vmem:[%s4879_s30 + $0x48] sm:$0xf]  ;;  %v611_v54 = vshrl.u32 %v5048_v30, 16 }
  0x34   : > { %4131 = vmatprep.subr.bf16.mxu0 %v4584_v45  ;;  %v4629_v45 = vld [vmem:[%s6114_s1 + $0x138] sm:$0xff]   ;;  %v5075_v47 = vcombine.low %v3553_v39, %v5062_v40 }
  0x35   : > { %4240 = vmatpush3.bf16.msra.mxu1 %v4609_v15 }
  0x36   : > { %2419 = vmatmul.mubr.bf16.gmra.mrb[8].mxu0 %v4923_v8  ;;  %v592_v8 = vor.u32 %v591_v1, %v587_v58  ;;  %4241 = vmatprep.subr.bf16.mxu1 %v4622_v28  ;;  %v811_v58 = vrot.slane %v5021_v14, 1  ;;  %v4636_v1 = vld [vmem:[%s6114_s1 + $0x1a8] sm:$0xff]   ;;  %v632_v28 = vrot.slane %v630_v17, 1 }
  0x37   : > { %2426 = vmatprep.mubr.bf16.mxu0 %v585_v0  ;;  %4132 = vmatpush3.bf16.msra.mxu0 %v4587_v60  ;;  %v810_v60 = vrot.slane %v3708_v42, 1  ;;  %v253_v0 = vld [vmem:[%s4879_s30 + $0x48] sm:$0xe]  ;;  %v5159_v42 = vcombine.low %v217_v33, %v218_v34 }
  0x38   : > { %2580 = vmatmul.mubr.bf16.gmra.mrb[8].mxu1 %v803_v56  ;;  %4133 = vmatprep.subr.bf16.mxu0 %v4598_v2  ;;  %v597_v22 = vsel %vm537_vm0, %v592_v8, %v596_v9  ;;  %v5087_v56 = vcombine.low %v213_v43, %v5079_v49  ;;  %v620_v2 = vrot.slane %v618_v48, 1  ;;  %v5116_v8 = vld [vmem:[%s4879_s30 + $0x64] sm:$0xf]  ;;  %v3709_v11 = vcombine.low %v253_v0, %v5042_v27  ;;  %v255_v48 = vld [vmem:[%s4879_s30 + $0x60] sm:$0xe] }
  0x39   : > { %2587 = vmatprep.mubr.bf16.mxu1 %v4985_v53  ;;  %4242 = vmatpush3.bf16.msra.mxu1 %v4623_v31  ;;  %v812_v9 = vsel %vm794_vm1, %v810_v60, %v811_v58  ;;  %v5123_v12 = vcombine.low %v215_v6, %v5116_v8  ;;  %v5147_v31 = vld [vmem:[%s4879_s30 + $0x64] sm:$0xf]  ;;  %v817_v43 = vrot.slane %v5108_v4, 1  ;;  %v816_v49 = vrot.slane %v3710_v36, 1  ;;  %v220_v58 = vld [vmem:[%s4879_s30 + $0x7c] sm:$0xf] }
  0x3a   : > { %4243 = vmatprep.subr.bf16.mxu1 %v4631_v50  ;;  %v625_v5 = vshll.u32 %v5087_v56, 16  ;;  %v623_v15 = vshrl.u32 %v5087_v56, 16  ;;  %v813_v26 = vrot.slane %v3709_v11, 1  ;;  %v3711_v61 = vcombine.low %v255_v48, %v5116_v8  ;;  %v3562_v4 = vld [vmem:[%s4879_s30 + $0x7c] sm:$0xf] }
  0x3b   : > { %4134 = vmatpush3.bf16.msra.mxu0 %v4601_v7  ;;  %v4641_v7 = vld [vmem:[%s6114_s1 + $0x1b0] sm:$0xff]   ;;  %v635_v35 = vshrl.u32 %v5123_v12, 16  ;;  %v647_v63 = vshrl.u32 %v5159_v42, 16 }
  0x3c   : > { %4135 = vmatprep.subr.bf16.mxu0 %v4612_v16  ;;  %v627_v16 = vrot.slane %v625_v5, 1  ;;  %v815_v39 = vsel %vm794_vm1, %v813_v26, %v814_v19  ;;  %v256_v5 = vld [vmem:[%s4879_s30 + $0x6c] sm:$0xe]  ;;  %v819_v6 = vrot.slane %v3711_v61, 1  ;;  %v257_v26 = vld [vmem:[%s4879_s30 + $0x78] sm:$0xe] }
  0x3d   : > { %4244 = vmatpush3.bf16.msra.mxu1 %v4632_v57  ;;  %v219_v57 = vld [vmem:[%s4879_s30 + $0x78] sm:$0xf]  ;;  %v3712_v17 = vcombine.low %v256_v5, %v218_v34 }
  0x3e   : > { %2427 = vmatmul.mubr.bf16.gmra.mrb[12].mxu0 %v4950_v32  ;;  %v613_v32 = vshll.u32 %v5048_v30, 16  ;;  %4245 = vmatprep.subr.bf16.mxu1 %v4633_v59  ;;  %v628_v27 = vor.u32 %v627_v16, %v623_v15  ;;  %v222_v15 = vld [vmem:[%s4879_s30 + $0x88] sm:$0xf]  ;;  %v4611_v61 = vld [vmem:[%s4879_s30 + $0x98] ss:$0 sps:$4 sm:$0x11]  }
  0x3f   : > { %2434 = vmatprep.mubr.bf16.mxu0 %v597_v22  ;;  %4136 = vmatpush3.bf16.msra.mxu0 %v4615_v20  ;;  %v4644_v20 = vld [vmem:[%s6114_s1 + $0x1b8] sm:$0xff]   ;;  %v3557_v22 = vld [vmem:[%s4879_s30 + $0x60] sm:$0xf] }
  0x40   : > { %2588 = vmatmul.mubr.bf16.gmra.mrb[12].mxu1 %v806_v21  ;;  %4137 = vmatprep.subr.bf16.mxu0 %v4626_v41  ;;  %v615_v55 = vrot.slane %v613_v32, 1  ;;  %v5139_v21 = vld [vmem:[%s6114_s1 + $0x200] sm:$0xff]   ;;  %v633_v32 = vsel %vm537_vm0, %v628_v27, %v632_v28  ;;  %v5157_v41 = vcombine.low %v3557_v22, %v5147_v31  ;;  %v822_v27 = vrot.slane %v3712_v17, 1 }
  0x41   : > { %2595 = vmatprep.mubr.bf16.mxu1 %v5037_v24  ;;  %4246 = vmatpush3.bf16.msra.mxu1 %v4636_v1  ;;  %v3563_v28 = vld [vmem:[%s4879_s30 + $0x84] sm:$0xf] }
  0x42   : > { %4247 = vmatprep.subr.bf16.mxu1 %v4640_v3  ;;  %v820_v3 = vrot.slane %v4583_v25, 1 }
  0x43   : > { %4138 = vmatpush3.bf16.msra.mxu0 %v4629_v45  ;;  %v3559_v45 = vld [vmem:[%s4879_s30 + $0x6c] sm:$0xf] }
  0x44   : > { %4395 = vmatprep.subr.bf16.mxu0 %v5139_v21 }
  0x45   : > { %4248 = vmatpush3.bf16.msra.mxu1 %v4641_v7  ;;  %v4597_v7 = vld [vmem:[%s4879_s30 + $0x80] ss:$0 sps:$4 sm:$0x11]  }
  0x46   : > { %2435 = vmatmul.mubr.bf16.gmra.mrb[16].mxu0 %v4980_v51  ;;  %v616_v51 = vor.u32 %v615_v55, %v611_v54  ;;  %4249 = vmatprep.subr.bf16.mxu1 %v4642_v18  ;;  %v4590_v54 = vld [vmem:[%s4879_s30 + $0x74] ss:$0 sps:$4 sm:$0x11]   ;;  %v649_v55 = vshll.u32 %v5159_v42, 16  ;;  %v666_v22 = vshll.u32 %v4597_v7, 16 }
  0x47   : > { %2442 = vmatprep.mubr.bf16.mxu0 %v609_v52  ;;  %v644_v52 = vrot.slane %v642_v38, 1  ;;  %v654_v1 = vshll.u32 %v4590_v54, 16  ;;  %v223_v38 = vld [vmem:[%s4879_s30 + $0x90] sm:$0xf] }
  0x48   : > { %2596 = vmatmul.mubr.bf16.gmra.mrb[16].mxu1 %v809_v46  ;;  %v621_v14 = vsel %vm537_vm0, %v616_v51, %v620_v2  ;;  %v5165_v46 = vld [vmem:[%s4879_s30 + $0x70] sm:$0xf]  ;;  %v651_v0 = vrot.slane %v649_v55, 1  ;;  %v5180_v2 = vcombine.low %v219_v57, %v220_v58  ;;  %v3561_v51 = vld [vmem:[%s4879_s30 + $0x78] sm:$0xf]  ;;  %v668_v34 = vrot.slane %v666_v22, 1 }
  0x49   : > { %2603 = vmatprep.mubr.bf16.mxu1 %v5075_v47  ;;  %4250 = vmatpush3.bf16.msra.mxu1 %v4644_v20  ;;  %v5176_v60 = vcombine.low %v3559_v45, %v5165_v46  ;;  %v5192_v16 = vcombine.low %v3561_v51, %v3562_v4  ;;  %v3565_v55 = vld [vmem:[%s4879_s30 + $0x90] sm:$0xf]  ;;  %v3566_v57 = vld [vmem:[%s4879_s30 + $0x94] sm:$0xf]  ;;  %v829_v4 = vrot.slane %v4604_v29, 1 }
  0x4a   : > { %v652_v8 = vor.u32 %v651_v0, %v647_v63  ;;  %v661_v11 = vshll.u32 %v5180_v2, 16  ;;  %v659_v18 = vshrl.u32 %v5180_v2, 16  ;;  %v225_v0 = vld [vmem:[%s4879_s30 + $0x9c] sm:$0xf]  ;;  %v227_v22 = vld [vmem:[%s4879_s30 + $0xa8] sm:$0xf] }
  0x4c   : > { %v663_v20 = vrot.slane %v661_v11, 1  ;;  %v3567_v11 = vld [vmem:[%s4879_s30 + $0x9c] sm:$0xf] }
  0x4e   : > { %2443 = vmatmul.mubr.bf16.gmra.mrb[20].mxu0 %v5018_v13  ;;  %v637_v13 = vshll.u32 %v5123_v12, 16  ;;  %v664_v33 = vor.u32 %v663_v20, %v659_v18 }
  0x4f   : > { %2450 = vmatprep.mubr.bf16.mxu0 %v621_v14  ;;  %v221_v14 = vld [vmem:[%s4879_s30 + $0x84] sm:$0xf] }
  0x50   : > { %2604 = vmatmul.mubr.bf16.gmra.mrb[20].mxu1 %v812_v9  ;;  %v639_v37 = vrot.slane %v637_v13, 1  ;;  %v656_v9 = vrot.slane %v654_v1, 1  ;;  %v5196_v25 = vcombine.low %v221_v14, %v222_v15  ;;  %v823_v13 = vrot.slane %v4590_v54, 1  ;;  %v226_v1 = vld [vmem:[%s4879_s30 + $0xa0] sm:$0xf] }
  0x51   : > { %2611 = vmatprep.mubr.bf16.mxu1 %v5119_v10  ;;  %v669_v45 = vsel %vm537_vm0, %v664_v33, %v668_v34  ;;  %v826_v54 = vrot.slane %v4597_v7, 1  ;;  %v3568_v14 = vld [vmem:[%s4879_s30 + $0xa0] sm:$0xf] }
  0x52   : > { %v640_v50 = vor.u32 %v639_v37, %v635_v35  ;;  %v657_v19 = vsel %vm537_vm0, %v652_v8, %v656_v9  ;;  %v3564_v35 = vld [vmem:[%s4879_s30 + $0x88] sm:$0xf]  ;;  %v673_v36 = vshll.u32 %v5196_v25, 16  ;;  %v3713_v37 = vcombine.low %v257_v26, %v220_v58 }
  0x53   : > { %v671_v48 = vshrl.u32 %v5196_v25, 16  ;;  %v690_v8 = vshll.u32 %v4611_v61, 16  ;;  %v5228_v9 = vcombine.low %v225_v0, %v226_v1 }
  0x54   : > { %v645_v59 = vsel %vm537_vm0, %v640_v50, %v644_v52  ;;  %v825_v52 = vrot.slane %v3713_v37, 1 }
  0x55   : > { %v697_v20 = vshll.u32 %v5228_v9, 16 }
  0x56   : > { %2451 = vmatmul.mubr.bf16.gmra.mrb[24].mxu0 %v5048_v30  ;;  %v818_v30 = vsel %vm794_vm1, %v816_v49, %v817_v43  ;;  %v678_v43 = vshll.u32 %v4604_v29, 16  ;;  %v675_v49 = vrot.slane %v673_v36, 1  ;;  %v832_v36 = vrot.slane %v4611_v61, 1 }
  0x57   : > { %2458 = vmatprep.mubr.bf16.mxu0 %v633_v32  ;;  %v5208_v32 = vcombine.low %v3563_v28, %v3564_v35  ;;  %v695_v28 = vshrl.u32 %v5228_v9, 16  ;;  %v699_v33 = vrot.slane %v697_v20, 1 }
  0x58   : > { %2612 = vmatmul.mubr.bf16.gmra.mrb[24].mxu1 %v815_v39  ;;  %v224_v39 = vld [vmem:[%s4879_s30 + $0x94] sm:$0xf]  ;;  %v680_v58 = vrot.slane %v678_v43, 1 }
  0x59   : > { %2619 = vmatprep.mubr.bf16.mxu1 %v5157_v41  ;;  %v5212_v50 = vcombine.low %v223_v38, %v224_v39  ;;  %v3569_v38 = vld [vmem:[%s4879_s30 + $0xa8] sm:$0xf] }
  0x5b   : > { %v685_v63 = vshll.u32 %v5212_v50, 16  ;;  %v683_v5 = vshrl.u32 %v5212_v50, 16 }
  0x5d   : > { %v687_v7 = vrot.slane %v685_v63, 1 }
  0x5e   : > { %2459 = vmatmul.mubr.bf16.gmra.mrb[28].mxu0 %v5087_v56  ;;  %v821_v56 = vsel %vm794_vm1, %v819_v6, %v820_v3  ;;  %v827_v3 = vsel %vm794_vm1, %v825_v52, %v826_v54  ;;  %v229_v52 = vld [vmem:[%s4879_s30 + $0xb4] sm:$0xf]  ;;  %v5255_v54 = vld [vmem:[%s4879_s30 + $0xb8] sm:$0xf] }
  0x5f   : > { %2466 = vmatprep.mubr.bf16.mxu0 %v645_v59  ;;  %v676_v59 = vor.u32 %v675_v49, %v671_v48  ;;  %v688_v18 = vor.u32 %v687_v7, %v683_v5  ;;  %v260_v48 = vld [vmem:[%s4879_s30 + $0x9c] sm:$0xe]  ;;  %v5263_v63 = vcombine.low %v229_v52, %v5255_v54  ;;  %v261_v5 = vld [vmem:[%s4879_s30 + $0xa8] sm:$0xe] }
  0x60   : > { %2620 = vmatmul.mubr.bf16.gmra.mrb[28].mxu1 %v818_v30  ;;  %v258_v30 = vld [vmem:[%s4879_s30 + $0x84] sm:$0xe]  ;;  %v4635_v7 = vld [vmem:[%s4879_s30 + $0xbc] ss:$0 sps:$4 sm:$0x11]  }
  0x61   : > { %2627 = vmatprep.mubr.bf16.mxu1 %v5176_v60  ;;  %v3714_v51 = vcombine.low %v258_v30, %v222_v15  ;;  %v681_v6 = vsel %vm537_vm0, %v676_v59, %v680_v58  ;;  %v4618_v15 = vld [vmem:[%s4879_s30 + $0xa4] ss:$0 sps:$4 sm:$0x11]   ;;  %v726_v20 = vshll.u32 %v4635_v7, 16 }
  0x62   : > { %v702_v34 = vshll.u32 %v4618_v15, 16  ;;  %v835_v0 = vrot.slane %v4618_v15, 1 }
  0x63   : > { %v828_v17 = vrot.slane %v3714_v51, 1  ;;  %v3572_v51 = vld [vmem:[%s4879_s30 + $0xb8] sm:$0xf] }
  0x64   : > { %v704_v43 = vrot.slane %v702_v34, 1  ;;  %v728_v34 = vrot.slane %v726_v20, 1  ;;  %v4648_v20 = vld [vmem:[%s4879_s30 + $0x20] ss:$0 sps:$4 sm:$0x11]  }
  0x66   : > { %2467 = vmatmul.mubr.bf16.gmra.mrb[32].mxu0 %v5123_v12  ;;  %v824_v12 = vsel %vm794_vm1, %v822_v27, %v823_v13  ;;  %v228_v13 = vld [vmem:[%s4879_s30 + $0xac] sm:$0xf]  ;;  %v5240_v27 = vcombine.low %v3567_v11, %v3568_v14  ;;  %v3607_v11 = vld [vmem:[%s4879_s30 + $0x18] sm:$0xf]  ;;  %v3608_v14 = vld [vmem:[%s4879_s30 + $0x1c] sm:$0xf] }
  0x67   : > { %2474 = vmatprep.mubr.bf16.mxu0 %v657_v19  ;;  %v692_v19 = vrot.slane %v690_v8, 1  ;;  %v5244_v35 = vcombine.low %v227_v22, %v228_v13  ;;  %v721_v8 = vshll.u32 %v5263_v63, 16  ;;  %v5279_v22 = vcombine.low %v3607_v11, %v3608_v14  ;;  %v3611_v11 = vld [vmem:[%s4879_s30 + $0x30] sm:$0xf]  ;;  %v5310_v14 = vld [vmem:[%s4879_s30 + $0x34] sm:$0xf] }
  0x68   : > { %2628 = vmatmul.mubr.bf16.gmra.mrb[32].mxu1 %v821_v56  ;;  %v259_v56 = vld [vmem:[%s4879_s30 + $0x90] sm:$0xe] }
  0x69   : > { %2635 = vmatprep.mubr.bf16.mxu1 %v5192_v16  ;;  %v3715_v26 = vcombine.low %v259_v56, %v224_v39  ;;  %v693_v29 = vsel %vm537_vm0, %v688_v18, %v692_v19  ;;  %v4625_v39 = vld [vmem:[%s4879_s30 + $0xb0] ss:$0 sps:$4 sm:$0x11]   ;;  %v709_v49 = vshll.u32 %v5244_v35, 16  ;;  %v707_v59 = vshrl.u32 %v5244_v35, 16 }
  0x6a   : > { %v714_v58 = vshll.u32 %v4625_v39, 16  ;;  %v719_v18 = vshrl.u32 %v5263_v63, 16  ;;  %v723_v19 = vrot.slane %v721_v8, 1 }
  0x6b   : > { %v831_v37 = vrot.slane %v3715_v26, 1  ;;  %v711_v61 = vrot.slane %v709_v49, 1  ;;  %v3591_v26 = vld [vmem:[%s4879_s30 + $0xc] sm:$0xe] }
  0x6e   : > { %2475 = vmatmul.mubr.bf16.gmra.mrb[36].mxu0 %v5159_v42  ;;  %v5224_v42 = vcombine.low %v3565_v55, %v3566_v57  ;;  %v3716_v57 = vcombine.low %v260_v48, %v226_v1 }
  0x6f   : > { %2482 = vmatprep.mubr.bf16.mxu0 %v669_v45  ;;  %v3570_v45 = vld [vmem:[%s4879_s30 + $0xac] sm:$0xf] }
  0x70   : > { %2636 = vmatmul.mubr.bf16.gmra.mrb[36].mxu1 %v824_v12  ;;  %v700_v12 = vor.u32 %v699_v33, %v695_v28  ;;  %v5258_v55 = vcombine.low %v3569_v38, %v3570_v45  ;;  %v834_v1 = vrot.slane %v3716_v57, 1  ;;  %v3573_v28 = vld [vmem:[%s4879_s30 + $0xc0] sm:$0xf]  ;;  %v724_v33 = vor.u32 %v723_v19, %v719_v18  ;;  %v4724_v45 = vld [vmem:[%s4879_s30 + $0x10] sm:$0xf] }
  0x71   : > { %2643 = vmatprep.mubr.bf16.mxu1 %v5208_v32  ;;  %v1470_v38 = vshll.u32 %v5279_v22, 16 }
  0x72   : > { %v705_v30 = vsel %vm537_vm0, %v700_v12, %v704_v43  ;;  %v3609_v12 = vld [vmem:[%s4879_s30 + $0x24] sm:$0xf]  ;;  %v3610_v43 = vld [vmem:[%s4879_s30 + $0x28] sm:$0xf]  ;;  %v729_v48 = vsel %vm537_vm0, %v724_v33, %v728_v34 }
  0x73   : > { %v3593_v33 = vld [vmem:[%s4879_s30 + $0x24] sm:$0xe] }
  0x76   : > { %2483 = vmatmul.mubr.bf16.gmra.mrb[40].mxu0 %v5180_v2  ;;  %v830_v2 = vsel %vm794_vm1, %v828_v17, %v829_v4  ;;  %v716_v4 = vrot.slane %v714_v58, 1  ;;  %v3717_v17 = vcombine.low %v261_v5, %v228_v13  ;;  %v1468_v58 = vshrl.u32 %v5279_v22, 16 }
  0x77   : > { %2490 = vmatprep.mubr.bf16.mxu0 %v681_v6  ;;  %v712_v6 = vor.u32 %v711_v61, %v707_v59  ;;  %v5299_v59 = vcombine.low %v3609_v12, %v3610_v43  ;;  %v1006_v61 = vshll.u32 %v4898_v44, 16  ;;  %v1263_v12 = vrot.slane %v4648_v20, 1 }
  0x78   : > { %2644 = vmatmul.mubr.bf16.gmra.mrb[40].mxu1 %v827_v3  ;;  %v3571_v3 = vld [vmem:[%s4879_s30 + $0xb4] sm:$0xf]  ;;  %v837_v13 = vrot.slane %v3717_v17, 1 }
  0x79   : > { %2651 = vmatprep.mubr.bf16.mxu1 %v5224_v42  ;;  %v5275_v56 = vcombine.low %v3571_v3, %v3572_v51  ;;  %v717_v15 = vsel %vm537_vm0, %v712_v6, %v716_v4  ;;  %v841_v51 = vrot.slane %v4635_v7, 1  ;;  %v4650_v6 = vld [vmem:[%s4879_s30 + $0x2c] ss:$0 sps:$4 sm:$0x11]   ;;  %v1482_v8 = vshll.u32 %v5299_v59, 16 }
  0x7e   : > { %2491 = vmatmul.mubr.bf16.gmra.mrb[44].mxu0 %v5196_v25  ;;  %v833_v25 = vsel %vm794_vm1, %v831_v37, %v832_v36  ;;  %v3574_v36 = vld [vmem:[%s4879_s30 + $0xc4] sm:$0xf]  ;;  %v262_v37 = vld [vmem:[%s4879_s30 + $0xb4] sm:$0xe] }
  0x7f   : > { %2498 = vmatprep.mubr.bf16.mxu0 %v693_v29  ;;  %v4647_v29 = vld [vmem:[%s4879_s30 + $0x20] ss:$0 sps:$4 sm:$0x11]   ;;  %v5294_v49 = vcombine.low %v3573_v28, %v3574_v36  ;;  %v3718_v52 = vcombine.low %v262_v37, %v5255_v54  ;;  %v5319_v28 = vcombine.low %v3611_v11, %v5310_v14  ;;  %v5325_v37 = vld [vmem:[%s4879_s30 + $0x38] ss:$0 sps:$4 sm:$0x11]  }
  0x80   : > { %2652 = vmatmul.mubr.bf16.gmra.mrb[44].mxu1 %v830_v2  ;;  %v838_v2 = vrot.slane %v4625_v39, 1  ;;  %v1475_v57 = vshll.u32 %v4647_v29, 16  ;;  %v1018_v29 = vshll.u32 %v4914_v62, 16  ;;  %v4659_v11 = vld [vmem:[%s6114_s1 + $0x210] sm:$0xff]  }
  0x81   : > { %2659 = vmatprep.mubr.bf16.mxu1 %v5240_v27  ;;  %v840_v54 = vrot.slane %v3718_v52, 1  ;;  %v1016_v52 = vshrl.u32 %v4914_v62, 16 }
  0x82   : > { %v839_v39 = vsel %vm794_vm1, %v837_v13, %v838_v2  ;;  %v1477_v4 = vrot.slane %v1475_v57, 1  ;;  %v1484_v13 = vrot.slane %v1482_v8, 1  ;;  %v1023_v57 = vshll.u32 %v4648_v20, 16  ;;  %v3615_v20 = vld [vmem:[%s4879_s30 + $0x48] sm:$0xf] }
  0x83   : > { %v842_v19 = vsel %vm794_vm1, %v840_v54, %v841_v51  ;;  %v4652_v51 = vld [vmem:[%s6114_s1 + $0x208] sm:$0xff]  }
  0x86   : > { %2499 = vmatmul.mubr.bf16.gmra.mrb[48].mxu0 %v5212_v50  ;;  %v836_v50 = vsel %vm794_vm1, %v834_v1, %v835_v0  ;;  %v3592_v0 = vld [vmem:[%s4879_s30 + $0x18] sm:$0xe] }
  0x87   : > { %2506 = vmatprep.mubr.bf16.mxu0 %v705_v30  ;;  %v1472_v30 = vrot.slane %v1470_v38, 1 }
  0x88   : > { %2660 = vmatmul.mubr.bf16.gmra.mrb[48].mxu1 %v833_v25  ;;  %v4643_v25 = vld [vmem:[%s4879_s30 + $0x14] ss:$0 sps:$4 sm:$0x11]  }
  0x89   : > { %2667 = vmatprep.mubr.bf16.mxu1 %v5258_v55  ;;  %v1260_v1 = vrot.slane %v4643_v25, 1  ;;  %v1473_v5 = vor.u32 %v1472_v30, %v1468_v58  ;;  %v1011_v17 = vshll.u32 %v4643_v25, 16  ;;  %v1020_v25 = vrot.slane %v1018_v29, 1  ;;  %v4726_v58 = vld [vmem:[%s4879_s30 + $0x28] sm:$0xf] }
  0x8a   : > { %v3753_v30 = vcombine.low %v3593_v33, %v4726_v58 }
  0x8b   : > { %v1478_v2 = vsel %vm537_vm0, %v1473_v5, %v1477_v4  ;;  %v1013_v36 = vrot.slane %v1011_v17, 1  ;;  %v1499_v4 = vshll.u32 %v5325_v37, 16  ;;  %v1030_v5 = vshll.u32 %v4939_v23, 16 }
  0x8c   : > { %v1021_v8 = vor.u32 %v1020_v25, %v1016_v52  ;;  %v5379_v52 = vld [vmem:[%s4879_s30 + $0x48] sm:$0xe] }
  0x8e   : > { %2507 = vmatmul.mubr.bf16.gmra.mrb[52].mxu0 %v5228_v9  ;;  %v3751_v9 = vcombine.low %v3591_v26, %v4724_v45  ;;  %v1480_v26 = vshrl.u32 %v5299_v59, 16 }
  0x8f   : > { %2514 = vmatprep.mubr.bf16.mxu0 %v717_v15  ;;  %v4725_v15 = vld [vmem:[%s4879_s30 + $0x1c] sm:$0xf] }
  0x90   : > { %2668 = vmatmul.mubr.bf16.gmra.mrb[52].mxu1 %v836_v50  ;;  %v1259_v3 = vrot.slane %v3751_v9, 1  ;;  %v1008_v50 = vrot.slane %v1006_v61, 1  ;;  %v3752_v18 = vcombine.low %v3592_v0, %v4725_v15  ;;  %v1485_v43 = vor.u32 %v1484_v13, %v1480_v26  ;;  %v4651_v0 = vld [vmem:[%s4879_s30 + $0x2c] ss:$0 sps:$4 sm:$0x11]  }
  0x91   : > { %2675 = vmatprep.mubr.bf16.mxu1 %v5275_v56  ;;  %v1494_v9 = vshll.u32 %v5319_v28, 16  ;;  %v1266_v17 = vrot.slane %v4651_v0, 1  ;;  %v5354_v15 = vld [vmem:[%s4879_s30 + $0x44] ss:$0 sps:$4 sm:$0x11]   ;;  %v1028_v13 = vshrl.u32 %v4939_v23, 16 }
  0x92   : > { %v1261_v7 = vsel %vm794_vm1, %v1259_v3, %v1260_v1  ;;  %v1262_v38 = vrot.slane %v3752_v18, 1  ;;  %v1492_v1 = vshrl.u32 %v5319_v28, 16  ;;  %v5360_v26 = vld [vmem:[%s4879_s30 + $0x4c] sm:$0xf]  ;;  %v1035_v29 = vshll.u32 %v4651_v0, 16  ;;  %v4666_v23 = vld [vmem:[%s6114_s1 + $0x218] sm:$0xff]  }
  0x93   : > { %v1496_v62 = vrot.slane %v1494_v9, 1  ;;  %v1042_v9 = vshll.u32 %v4985_v53, 16 }
  0x94   : > { %v1264_v61 = vsel %vm794_vm1, %v1262_v38, %v1263_v12  ;;  %v1511_v12 = vshll.u32 %v5354_v15, 16 }
  0x96   : > { %2515 = vmatmul.mubr.bf16.gmra.mrb[56].mxu0 %v5244_v35  ;;  %v1004_v35 = vshrl.u32 %v4898_v44, 16  ;;  %v1487_v44 = vshll.u32 %v4650_v6, 16  ;;  %v3594_v6 = vld [vmem:[%s4879_s30 + $0x30] sm:$0xe]  ;;  %v1513_v0 = vrot.slane %v1511_v12, 1 }
  0x97   : > { %2522 = vmatprep.mubr.bf16.mxu0 %v729_v48  ;;  %v5330_v48 = vld [vmem:[%s4879_s30 + $0x40] sm:$0xf] }
  0x98   : > { %2676 = vmatmul.mubr.bf16.gmra.mrb[56].mxu1 %v839_v39  ;;  %v1009_v34 = vor.u32 %v1008_v50, %v1004_v35  ;;  %v1489_v45 = vrot.slane %v1487_v44, 1  ;;  %v3613_v39 = vld [vmem:[%s4879_s30 + $0x3c] sm:$0xf]  ;;  %v1025_v35 = vrot.slane %v1023_v57, 1  ;;  %v1265_v50 = vrot.slane %v3753_v30, 1 }
  0x99   : > { %2683 = vmatprep.mubr.bf16.mxu1 %v5294_v49  ;;  %v5338_v3 = vcombine.low %v3613_v39, %v5330_v48  ;;  %v1032_v44 = vrot.slane %v1030_v5, 1  ;;  %v3595_v39 = vld [vmem:[%s4879_s30 + $0x3c] sm:$0xe]  ;;  %v1037_v57 = vrot.slane %v1035_v29, 1  ;;  %v3617_v5 = vld [vmem:[%s4879_s30 + $0x54] sm:$0xf] }
  0x9a   : > { %v1490_v54 = vsel %vm537_vm0, %v1485_v43, %v1489_v45  ;;  %v1267_v33 = vsel %vm794_vm1, %v1265_v50, %v1266_v17  ;;  %v5370_v45 = vcombine.low %v3615_v20, %v5360_v26  ;;  %v4658_v17 = vld [vmem:[%s4879_s30 + $0x44] ss:$0 sps:$4 sm:$0x11]  }
  0x9b   : > { %v1506_v18 = vshll.u32 %v5338_v3, 16  ;;  %v1033_v25 = vor.u32 %v1032_v44, %v1028_v13  ;;  %v1090_v13 = vshll.u32 %v5157_v41, 16 }
  0x9d   : > { %v1508_v38 = vrot.slane %v1506_v18, 1  ;;  %v1066_v18 = vshll.u32 %v5075_v47, 16 }
  0x9e   : > { %2523 = vmatmul.mubr.bf16.gmra.mrb[60].mxu0 %v5263_v63  ;;  %v1014_v63 = vsel %vm537_vm0, %v1009_v34, %v1013_v36  ;;  %v4655_v34 = vld [vmem:[%s4879_s30 + $0x38] ss:$0 sps:$4 sm:$0x11]   ;;  %v1504_v36 = vshrl.u32 %v5338_v3, 16 }
  0x9f   : > { %2724 = vmatprep.mubr.bf16.mxu0 %v1261_v7  ;;  %v1269_v30 = vrot.slane %v4655_v34, 1  ;;  %v1047_v50 = vshll.u32 %v4655_v34, 16 }
  0xa0   : > { %2684 = vmatmul.mubr.bf16.gmra.mrb[60].mxu1 %v842_v19  ;;  %v1501_v19 = vrot.slane %v1499_v4, 1  ;;  %v3756_v4 = vcombine.low %v5379_v52, %v5062_v40  ;;  %v1516_v40 = vshrl.u32 %v5370_v45, 16 }
  0xa1   : > { %2885 = vmatprep.mubr.bf16.mxu1 %v1478_v2  ;;  %v1026_v2 = vsel %vm537_vm0, %v1021_v8, %v1025_v35  ;;  %v1038_v8 = vsel %vm537_vm0, %v1033_v25, %v1037_v57  ;;  %v1040_v35 = vshrl.u32 %v4985_v53, 16  ;;  %v4680_v53 = vld [vmem:[%s6114_s1 + $0x228] sm:$0xff]   ;;  %v3619_v25 = vld [vmem:[%s4879_s30 + $0x60] sm:$0xf]  ;;  %v5425_v57 = vld [vmem:[%s4879_s30 + $0x64] sm:$0xf] }
  0xa6   : > { %2725 = vmatmul.mubr.bf16.vlgmr.msra.gmra.mrb[64].mxu0 %v1014_v63  ;;  %v1054_v63 = vshll.u32 %v5037_v24, 16 }
  0xa7   : > { %4396 = vmatpush3.bf16.msra.mxu0 %v5139_v21  ;;  %2732 = vmatprep.mubr.bf16.mxu0 %v1264_v61  ;;  %v1497_v21 = vor.u32 %v1496_v62, %v1492_v1  ;;  %v1509_v61 = vor.u32 %v1508_v38, %v1504_v36  ;;  %v4728_v1 = vld [vmem:[%s4879_s30 + $0x40] sm:$0xf]  ;;  %v1049_v36 = vrot.slane %v1047_v50, 1  ;;  %v1272_v38 = vrot.slane %v4658_v17, 1 }
  0xa8   : > { %2886 = vmatmul.mubr.bf16.vlgmr.msra.gmra.mrb[64].mxu1 %v5279_v22  ;;  %4397 = vmatprep.subr.bf16.mxu0 %v4652_v51  ;;  %v4727_v22 = vld [vmem:[%s4879_s30 + $0x34] sm:$0xf]  ;;  %v3755_v62 = vcombine.low %v3595_v39, %v4728_v1  ;;  %v1056_v12 = vrot.slane %v1054_v63, 1  ;;  %v3621_v63 = vld [vmem:[%s4879_s30 + $0x6c] sm:$0xf]  ;;  %v1064_v1 = vshrl.u32 %v5075_v47, 16 }
  0xa9   : > { %2893 = vmatprep.mubr.bf16.mxu1 %v1490_v54  ;;  %v3754_v7 = vcombine.low %v3594_v6, %v4727_v22  ;;  %v1502_v43 = vsel %vm537_vm0, %v1497_v21, %v1501_v19  ;;  %v4673_v54 = vld [vmem:[%s6114_s1 + $0x220] sm:$0xff]   ;;  %v5394_v6 = vld [vmem:[%s4879_s30 + $0x58] sm:$0xf]  ;;  %v1078_v21 = vshll.u32 %v5119_v10, 16  ;;  %v1514_v22 = vsel %vm537_vm0, %v1509_v61, %v1513_v0  ;;  %v5435_v61 = vld [vmem:[%s4879_s30 + $0x6c] sm:$0xe] }
  0xaa   : > { %v1271_v29 = vrot.slane %v3755_v62, 1  ;;  %v1068_v62 = vrot.slane %v1066_v18, 1  ;;  %v4694_v18 = vld [vmem:[%s6114_s1 + $0x238] sm:$0xff]  }
  0xab   : > { %4398 = vmatpush3.bf16.msra.mxu0 %v4652_v51  ;;  %v1268_v58 = vrot.slane %v3754_v7, 1  ;;  %v5386_v51 = vld [vmem:[%s4879_s30 + $0x50] ss:$0 sps:$4 sm:$0x11]  }
  0xac   : > { %4399 = vmatprep.subr.bf16.mxu0 %v4659_v11  ;;  %v1523_v20 = vshll.u32 %v5386_v51, 16 }
  0xad   : > { %v1270_v19 = vsel %vm794_vm1, %v1268_v58, %v1269_v30  ;;  %v5429_v58 = vld [vmem:[%s4879_s30 + $0x70] sm:$0xf]  ;;  %v5432_v30 = vld [vmem:[%s4879_s30 + $0x60] sm:$0xe] }
  0xae   : > { %2733 = vmatmul.mubr.bf16.gmra.mrb[68].mxu0 %v1026_v2  ;;  %v5406_v2 = vcombine.low %v3617_v5, %v5394_v6  ;;  %v1525_v39 = vrot.slane %v1523_v20, 1  ;;  %v1273_v5 = vsel %vm794_vm1, %v1271_v29, %v1272_v38  ;;  %v5451_v47 = vcombine.low %v3621_v63, %v5429_v58  ;;  %v5461_v20 = vld [vmem:[%s4879_s30 + $0x74] ss:$0 sps:$4 sm:$0x11]   ;;  %v5466_v38 = vld [vmem:[%s4879_s30 + $0x7c] sm:$0xf] }
  0xaf   : > { %2740 = vmatprep.mubr.bf16.mxu0 %v1267_v33  ;;  %4400 = vmatpush3.bf16.msra.mxu0 %v4659_v11  ;;  %v1044_v11 = vrot.slane %v1042_v9, 1  ;;  %v1052_v33 = vshrl.u32 %v5037_v24, 16  ;;  %v1059_v24 = vshll.u32 %v4658_v17, 16 }
  0xb0   : > { %2894 = vmatmul.mubr.bf16.gmra.mrb[68].mxu1 %v5299_v59  ;;  %v1518_v59 = vshll.u32 %v5370_v45, 16  ;;  %4401 = vmatprep.subr.bf16.mxu0 %v4666_v23  ;;  %v1530_v52 = vshll.u32 %v5406_v2, 16 }
  0xb1   : > { %2901 = vmatprep.mubr.bf16.mxu1 %v1502_v43  ;;  %v1045_v34 = vor.u32 %v1044_v11, %v1040_v35  ;;  %v4687_v43 = vld [vmem:[%s6114_s1 + $0x230] sm:$0xff]   ;;  %v5443_v35 = vld [vmem:[%s4879_s30 + $0x5c] ss:$0 sps:$4 sm:$0x11]   ;;  %v5446_v11 = vcombine.low %v3619_v25, %v5425_v57  ;;  %v1069_v25 = vor.u32 %v1068_v62, %v1064_v1 }
  0xb2   : > { %v1520_v7 = vrot.slane %v1518_v59, 1  ;;  %v1274_v59 = vrot.slane %v3756_v4, 1  ;;  %v1532_v17 = vrot.slane %v1530_v52, 1  ;;  %v1554_v52 = vshll.u32 %v5451_v47, 16 }
  0xb3   : > { %4402 = vmatpush3.bf16.msra.mxu0 %v4666_v23  ;;  %v5419_v23 = vld [vmem:[%s4879_s30 + $0x5c] ss:$0 sps:$4 sm:$0x11]   ;;  %v1050_v0 = vsel %vm537_vm0, %v1045_v34, %v1049_v36  ;;  %v3623_v36 = vld [vmem:[%s4879_s30 + $0x78] sm:$0xf]  ;;  %v1083_v63 = vshll.u32 %v5443_v35, 16 }
  0xb4   : > { %4403 = vmatprep.subr.bf16.mxu0 %v4673_v54  ;;  %v1521_v9 = vor.u32 %v1520_v7, %v1516_v40  ;;  %v1535_v4 = vshll.u32 %v5419_v23, 16  ;;  %v1061_v40 = vrot.slane %v1059_v24, 1  ;;  %v5458_v7 = vld [vmem:[%s4879_s30 + $0x68] ss:$0 sps:$4 sm:$0x11]   ;;  %v1076_v24 = vshrl.u32 %v5119_v10, 16 }
  0xb5   : > { %v5485_v10 = vld [vmem:[%s4879_s30 + $0x68] ss:$0 sps:$4 sm:$0x11]   ;;  %v1547_v62 = vshll.u32 %v5458_v7, 16 }
  0xb6   : > { %2741 = vmatmul.mubr.bf16.gmra.mrb[72].mxu0 %v1038_v8  ;;  %v1528_v8 = vshrl.u32 %v5406_v2, 16  ;;  %v1526_v50 = vsel %vm537_vm0, %v1521_v9, %v1525_v39  ;;  %v3758_v9 = vcombine.low %v5432_v30, %v5147_v31  ;;  %v1542_v39 = vshll.u32 %v5446_v11, 16 }
  0xb7   : > { %2748 = vmatprep.mubr.bf16.mxu0 %v1270_v19  ;;  %4404 = vmatpush3.bf16.msra.mxu0 %v4673_v54  ;;  %v4662_v54 = vld [vmem:[%s4879_s30 + $0x50] ss:$0 sps:$4 sm:$0x11]   ;;  %v4729_v19 = vld [vmem:[%s4879_s30 + $0x58] sm:$0xf]  ;;  %v5479_v30 = vcombine.low %v3623_v36, %v5466_v38  ;;  %v1281_v36 = vrot.slane %v5485_v10, 1 }
  0xb8   : > { %2902 = vmatmul.mubr.bf16.gmra.mrb[72].mxu1 %v5319_v28  ;;  %v3597_v28 = vld [vmem:[%s4879_s30 + $0x54] sm:$0xe]  ;;  %4405 = vmatprep.subr.bf16.mxu0 %v4680_v53  ;;  %v1275_v29 = vrot.slane %v4662_v54, 1  ;;  %v1071_v34 = vshll.u32 %v4662_v54, 16  ;;  %v1544_v1 = vrot.slane %v1542_v39, 1 }
  0xb9   : > { %2909 = vmatprep.mubr.bf16.mxu1 %v1514_v22  ;;  %v3757_v22 = vcombine.low %v3597_v28, %v4729_v19  ;;  %v3759_v28 = vcombine.low %v5435_v61, %v5165_v46  ;;  %v5493_v19 = vld [vmem:[%s4879_s30 + $0x80] ss:$0 sps:$4 sm:$0x11]   ;;  %v5640_v61 = vld [vmem:[%s4879_s30 + $0xc8] ss:$0 sps:$4 sm:$0x11]  }
  0xba   : > { %v1073_v54 = vrot.slane %v1071_v34, 1 }
  0xbb   : > { %4406 = vmatpush3.bf16.msra.mxu0 %v4680_v53  ;;  %v1057_v53 = vor.u32 %v1056_v12, %v1052_v33  ;;  %v1537_v33 = vrot.slane %v1535_v4, 1  ;;  %v1080_v12 = vrot.slane %v1078_v21, 1  ;;  %v1277_v31 = vrot.slane %v3757_v22, 1 }
  0xbc   : > { %4407 = vmatprep.subr.bf16.mxu0 %v4687_v43  ;;  %v1540_v21 = vshrl.u32 %v5446_v11, 16  ;;  %v1556_v4 = vrot.slane %v1554_v52, 1  ;;  %v1280_v22 = vrot.slane %v3758_v9, 1  ;;  %v3658_v9 = vld [vmem:[%s4879_s30 + $0x3c] sm:$0xe] }
  0xbe   : > { %2749 = vmatmul.mubr.bf16.gmra.mrb[76].mxu0 %v1050_v0  ;;  %v1062_v0 = vsel %vm537_vm0, %v1057_v53, %v1061_v40  ;;  %v1088_v40 = vshrl.u32 %v5157_v41, 16  ;;  %v1566_v53 = vshll.u32 %v5479_v30, 16  ;;  %v1545_v39 = vor.u32 %v1544_v1, %v1540_v21  ;;  %v3661_v21 = vld [vmem:[%s4879_s30 + $0x60] sm:$0xe]  ;;  %v3662_v1 = vld [vmem:[%s4879_s30 + $0x6c] sm:$0xe] }
  0xbf   : > { %2756 = vmatprep.mubr.bf16.mxu0 %v1273_v5  ;;  %4408 = vmatpush3.bf16.msra.mxu0 %v4687_v43  ;;  %v1276_v43 = vsel %vm794_vm1, %v1274_v59, %v1275_v29  ;;  %v1278_v5 = vrot.slane %v5443_v35, 1  ;;  %v1552_v59 = vshrl.u32 %v5451_v47, 16  ;;  %v1085_v35 = vrot.slane %v1083_v63, 1  ;;  %v3657_v29 = vld [vmem:[%s4879_s30 + $0x30] sm:$0xe] }
  0xc0   : > { %2910 = vmatmul.mubr.bf16.gmra.mrb[76].mxu1 %v5338_v3  ;;  %v1533_v3 = vor.u32 %v1532_v17, %v1528_v8  ;;  %4409 = vmatprep.subr.bf16.mxu0 %v4694_v18  ;;  %v1559_v8 = vshll.u32 %v5461_v20, 16  ;;  %v1081_v17 = vor.u32 %v1080_v12, %v1076_v24  ;;  %v5504_v24 = vrot.slane %v1090_v13, 1  ;;  %v3659_v12 = vld [vmem:[%s4879_s30 + $0x48] sm:$0xe]  ;;  %v3660_v63 = vld [vmem:[%s4879_s30 + $0x54] sm:$0xe] }
  0xc1   : > { %2917 = vmatprep.mubr.bf16.mxu1 %v1526_v50  ;;  %v1279_v34 = vsel %vm794_vm1, %v1277_v31, %v1278_v5  ;;  %v1557_v52 = vor.u32 %v1556_v4, %v1552_v59  ;;  %v1571_v31 = vshll.u32 %v5493_v19, 16  ;;  %v3801_v13 = vcombine.low %v3657_v29, %v5310_v14  ;;  %v3664_v59 = vld [vmem:[%s4879_s30 + $0x84] sm:$0xe]  ;;  %v3626_v29 = vld [vmem:[%s4879_s30 + $0x88] sm:$0xf] }
  0xc2   : > { %v1538_v50 = vsel %vm537_vm0, %v1533_v3, %v1537_v33  ;;  %v1549_v3 = vrot.slane %v1547_v62, 1  ;;  %v1561_v33 = vrot.slane %v1559_v8, 1  ;;  %v3802_v5 = vcombine.low %v3658_v9, %v5330_v48 }
  0xc3   : > { %4410 = vmatpush3.bf16.msra.mxu0 %v4694_v18  ;;  %v1074_v18 = vsel %vm537_vm0, %v1069_v25, %v1073_v54  ;;  %v1564_v25 = vshrl.u32 %v5479_v30, 16  ;;  %v1730_v54 = vrot.slane %v5325_v37, 1  ;;  %v5523_v62 = vsel %vm794_vm1, %v1280_v22, %v1281_v36 }
  0xc4   : > { %v1729_v8 = vrot.slane %v3801_v13, 1  ;;  %v1733_v14 = vrot.slane %v5354_v15, 1  ;;  %v1550_v37 = vsel %vm537_vm0, %v1545_v39, %v1549_v3  ;;  %v1732_v4 = vrot.slane %v3802_v5, 1  ;;  %v5538_v15 = vld [vmem:[%s4879_s30 + $0x8c] ss:$0 sps:$4 sm:$0x11]  }
  0xc5   : > { %v1736_v48 = vrot.slane %v5386_v51, 1  ;;  %v5534_v22 = vsel %vm537_vm0, %v1557_v52, %v1561_v33  ;;  %v1739_v9 = vrot.slane %v5419_v23, 1  ;;  %v3666_v39 = vld [vmem:[%s4879_s30 + $0x9c] sm:$0xe]  ;;  %v5546_v51 = vld [vmem:[%s4879_s30 + $0x94] sm:$0xf]  ;;  %v1093_v46 = vor.u32 %v5504_v24, %v1088_v40 }
  0xc6   : > { %2757 = vmatmul.mubr.bf16.gmra.mrb[80].mxu0 %v1062_v0  ;;  %v5514_v0 = vsel %vm537_vm0, %v1081_v17, %v1085_v35  ;;  %v3663_v17 = vld [vmem:[%s4879_s30 + $0x78] sm:$0xe]  ;;  %v3804_v35 = vcombine.low %v3660_v63, %v5394_v6  ;;  %v5549_v6 = vld [vmem:[%s4879_s30 + $0x98] ss:$0 sps:$4 sm:$0x11]   ;;  %v5552_v3 = vsel %vm794_vm1, %v1732_v4, %v1733_v14  ;;  %v1742_v52 = vrot.slane %v5458_v7, 1 }
  0xc7   : > { %2764 = vmatprep.mubr.bf16.mxu0 %v1276_v43  ;;  %v5516_v43 = vrot.slane %v1566_v53, 1  ;;  %v3665_v53 = vld [vmem:[%s4879_s30 + $0x90] sm:$0xe]  ;;  %v5558_v23 = vld [vmem:[%s4879_s30 + $0xa0] sm:$0xf]  ;;  %v3806_v63 = vcombine.low %v3662_v1, %v5429_v58  ;;  %v3808_v14 = vcombine.low %v3664_v59, %v3626_v29 }
  0xc8   : > { %2918 = vmatmul.mubr.bf16.gmra.mrb[80].mxu1 %v5370_v45  ;;  %v1095_v45 = vshll.u32 %v5485_v10, 16  ;;  %v1738_v33 = vrot.slane %v3804_v35, 1  ;;  %v3667_v7 = vld [vmem:[%s4879_s30 + $0xa8] sm:$0xe]  ;;  %v3668_v58 = vld [vmem:[%s4879_s30 + $0xb4] sm:$0xe] }
  0xc9   : > { %2925 = vmatprep.mubr.bf16.mxu1 %v1538_v50  ;;  %v3803_v50 = vcombine.low %v3659_v12, %v5360_v26  ;;  %v5541_v26 = vsel %vm794_vm1, %v1729_v8, %v1730_v54  ;;  %v3805_v12 = vcombine.low %v3661_v21, %v5425_v57  ;;  %v1745_v54 = vrot.slane %v5461_v20, 1  ;;  %v5580_v1 = vld [vmem:[%s4879_s30 + $0xac] sm:$0xf]  ;;  %v5583_v20 = vld [vmem:[%s4879_s30 + $0xbc] ss:$0 sps:$4 sm:$0x11]  }
  0xca   : > { %v3807_v57 = vcombine.low %v3663_v17, %v5466_v38  ;;  %v5575_v5 = vsel %vm794_vm1, %v1738_v33, %v1739_v9  ;;  %v1748_v8 = vrot.slane %v5493_v19, 1  ;;  %v1744_v38 = vrot.slane %v3806_v63, 1  ;;  %v5588_v4 = vld [vmem:[%s4879_s30 + $0x78] sm:$0xe]  ;;  %v3669_v10 = vld [vmem:[%s4879_s30 + $0xc0] sm:$0xe] }
  0xcb   : > { %v1735_v36 = vrot.slane %v3803_v50, 1  ;;  %v1741_v21 = vrot.slane %v3805_v12, 1  ;;  %v1751_v17 = vrot.slane %v5538_v15, 1  ;;  %v5594_v35 = vld [vmem:[%s4879_s30 + $0xb8] sm:$0xf]  ;;  %v1750_v59 = vrot.slane %v3808_v14, 1 }
  0xcc   : > { %v1747_v50 = vrot.slane %v3807_v57, 1  ;;  %v1754_v9 = vrot.slane %v5549_v6, 1  ;;  %v3810_v33 = vcombine.low %v3666_v39, %v5558_v23  ;;  %v5602_v12 = vsel %vm794_vm1, %v1744_v38, %v1745_v54  ;;  %v3670_v40 = vld [vmem:[%s4879_s30 + $0xcc] sm:$0xe] }
  0xcd   : > { %v5564_v13 = vsel %vm794_vm1, %v1735_v36, %v1736_v48  ;;  %v5591_v48 = vld [vmem:[%s4879_s30 + $0x74] ss:$0 sps:$4 sm:$0x11]   ;;  %v5597_v36 = vsel %vm794_vm1, %v1741_v21, %v1742_v52  ;;  %v5609_v44 = vsel %vm794_vm1, %v1750_v59, %v1751_v17  ;;  %v3811_v21 = vcombine.low %v3667_v7, %v5580_v1 }
  0xce   : > { %2765 = vmatmul.mubr.bf16.gmra.mrb[84].mxu0 %v1074_v18  ;;  %v5561_v18 = vld [vmem:[%s4879_s30 + $0xa4] ss:$0 sps:$4 sm:$0x11]   ;;  %v1756_v52 = vrot.slane %v3810_v33, 1  ;;  %v1763_v38 = vrot.slane %v5583_v20, 1  ;;  %v1283_v7 = vrot.slane %v3759_v28, 1  ;;  %v1569_v24 = vor.u32 %v5516_v43, %v1564_v25 }
  0xcf   : > { %2772 = vmatprep.mubr.bf16.mxu0 %v1279_v34  ;;  %v5572_v34 = vld [vmem:[%s4879_s30 + $0xb0] ss:$0 sps:$4 sm:$0x11]   ;;  %v1757_v57 = vrot.slane %v5561_v18, 1  ;;  %v1759_v17 = vrot.slane %v3811_v21, 1  ;;  %v1100_v59 = vshrl.u32 %v5176_v60, 16 }
  0xd0   : > { %2926 = vmatmul.mubr.bf16.gmra.mrb[84].mxu1 %v5406_v2  ;;  %v3625_v2 = vld [vmem:[%s4879_s30 + $0x84] sm:$0xf]  ;;  %v1760_v14 = vrot.slane %v5572_v34, 1  ;;  %v1107_v43 = vshll.u32 %v5591_v48, 16 }
  0xd1   : > { %2933 = vmatprep.mubr.bf16.mxu1 %v1550_v37  ;;  %v3809_v37 = vcombine.low %v3665_v53, %v5546_v51  ;;  %v5605_v53 = vsel %vm794_vm1, %v1747_v50, %v1748_v8  ;;  %v5613_v39 = vcombine.low %v3625_v2, %v3626_v29  ;;  %v3812_v8 = vcombine.low %v3668_v58, %v5594_v35  ;;  %v5627_v29 = vld [vmem:[%s4879_s30 + $0xc4] sm:$0xf]  ;;  %v4730_v58 = vld [vmem:[%s4879_s30 + $0x7c] sm:$0xf] }
  0xd2   : > { %v1097_v50 = vrot.slane %v1095_v45, 1  ;;  %v5630_v2 = vsel %vm794_vm1, %v1756_v52, %v1757_v57  ;;  %v1284_v45 = vrot.slane %v5591_v48, 1  ;;  %v3813_v41 = vcombine.low %v3669_v10, %v5627_v29 }
  0xd3   : > { %v1753_v63 = vrot.slane %v3809_v37, 1  ;;  %v3760_v37 = vcombine.low %v5588_v4, %v4730_v58  ;;  %v1762_v28 = vrot.slane %v3812_v8, 1  ;;  %v5648_v4 = vld [vmem:[%s4879_s30 + $0xd0] sm:$0xf]  ;;  %v1766_v52 = vrot.slane %v5640_v61, 1 }
  0xd4   : > { %v1765_v57 = vrot.slane %v3813_v41, 1  ;;  %v1098_v25 = vsel %vm537_vm0, %v1093_v46, %v1097_v50  ;;  %v1285_v8 = vsel %vm794_vm1, %v1283_v7, %v1284_v45  ;;  %v1114_v7 = vshll.u32 %v5192_v16, 16  ;;  %v3601_v41 = vld [vmem:[%s4879_s30 + $0x84] sm:$0xe] }
  0xd5   : > { %v5616_v54 = vsel %vm794_vm1, %v1753_v63, %v1754_v9  ;;  %v5663_v19 = vsel %vm794_vm1, %v1762_v28, %v1763_v38  ;;  %v6118_v9 = vshll.u32 %v5176_v60, 16  ;;  %v3627_v63 = vld [vmem:[%s4879_s30 + $0x90] sm:$0xf]  ;;  %v4676_v38 = vld [vmem:[%s4879_s30 + $0x80] ss:$0 sps:$4 sm:$0x11]  }
  0xd6   : > { %2773 = vmatmul.mubr.bf16.gmra.mrb[88].mxu0 %v5514_v0  ;;  %v1573_v0 = vrot.slane %v1571_v31, 1  ;;  %v3814_v31 = vcombine.low %v3670_v40, %v5648_v4  ;;  %v1583_v60 = vshll.u32 %v5538_v15, 16  ;;  %v5679_v58 = vsel %vm794_vm1, %v1765_v57, %v1766_v52  ;;  %v4731_v57 = vld [vmem:[%s4879_s30 + $0x88] sm:$0xf] }
  0xd7   : > { %2780 = vmatprep.mubr.bf16.mxu0 %v5523_v62  ;;  %v1578_v62 = vshll.u32 %v5613_v39, 16  ;;  %v1104_v33 = vrot.slane %v6118_v9, 1  ;;  %v5683_v48 = vcombine.low %v3627_v63, %v5546_v51  ;;  %v1109_v46 = vrot.slane %v1107_v43, 1 }
  0xd8   : > { %2934 = vmatmul.mubr.bf16.gmra.mrb[88].mxu1 %v5446_v11  ;;  %v5651_v11 = vsel %vm794_vm1, %v1759_v17, %v1760_v14  ;;  %v1768_v21 = vrot.slane %v3814_v31, 1  ;;  %v1576_v17 = vshrl.u32 %v5613_v39, 16  ;;  %v1574_v28 = vsel %vm537_vm0, %v1569_v24, %v1573_v0 }
  0xd9   : > { %2941 = vmatprep.mubr.bf16.mxu1 %v5534_v22  ;;  %v5660_v22 = vld [vmem:[%s4879_s30 + $0xd4] ss:$0 sps:$4 sm:$0x11]   ;;  %v1580_v10 = vrot.slane %v1578_v62, 1  ;;  %v1105_v15 = vor.u32 %v1104_v33, %v1100_v59  ;;  %v1286_v45 = vrot.slane %v3760_v37, 1  ;;  %v1287_v0 = vrot.slane %v4676_v38, 1 }
  0xda   : > { %v1769_v14 = vrot.slane %v5660_v22, 1  ;;  %v1585_v51 = vrot.slane %v1583_v60, 1  ;;  %v1590_v24 = vshll.u32 %v5683_v48, 16  ;;  %v3629_v62 = vld [vmem:[%s4879_s30 + $0x9c] sm:$0xf]  ;;  %v1112_v9 = vshrl.u32 %v5192_v16, 16 }
  0xdb   : > { %v1581_v40 = vor.u32 %v1580_v10, %v1576_v17  ;;  %v1110_v31 = vsel %vm537_vm0, %v1105_v15, %v1109_v46  ;;  %v1116_v63 = vrot.slane %v1114_v7, 1  ;;  %v3761_v52 = vcombine.low %v3601_v41, %v4731_v57  ;;  %v4679_v33 = vld [vmem:[%s4879_s30 + $0x8c] ss:$0 sps:$4 sm:$0x11]  }
  0xdc   : > { %v5686_v50 = vsel %vm794_vm1, %v1768_v21, %v1769_v14  ;;  %v1288_v59 = vsel %vm794_vm1, %v1286_v45, %v1287_v0  ;;  %v1588_v37 = vshrl.u32 %v5683_v48, 16  ;;  %v1592_v43 = vrot.slane %v1590_v24, 1  ;;  %v4732_v0 = vld [vmem:[%s4879_s30 + $0x94] sm:$0xf] }
  0xdd   : > { %v1595_v21 = vshll.u32 %v5549_v6, 16  ;;  %v5702_v14 = vcombine.low %v3629_v62, %v5558_v23  ;;  %v1126_v16 = vshll.u32 %v5208_v32, 16  ;;  %v1289_v17 = vrot.slane %v3761_v52, 1  ;;  %v3631_v23 = vld [vmem:[%s4879_s30 + $0xa8] sm:$0xf] }
  0xde   : > { %2781 = vmatmul.mubr.bf16.gmra.mrb[92].mxu0 %v1098_v25  ;;  %v1586_v25 = vsel %vm537_vm0, %v1581_v40, %v1585_v51  ;;  %v1290_v60 = vrot.slane %v4679_v33, 1  ;;  %v1593_v10 = vor.u32 %v1592_v43, %v1588_v37  ;;  %v1124_v46 = vshrl.u32 %v5208_v32, 16  ;;  %v4683_v51 = vld [vmem:[%s4879_s30 + $0x98] ss:$0 sps:$4 sm:$0x11]  }
  0xdf   : > { %2788 = vmatprep.mubr.bf16.mxu0 %v1285_v8  ;;  %v1117_v8 = vor.u32 %v1116_v63, %v1112_v9  ;;  %v1597_v7 = vrot.slane %v1595_v21, 1  ;;  %v1602_v6 = vshll.u32 %v5702_v14, 16  ;;  %v1131_v45 = vshll.u32 %v4679_v33, 16  ;;  %v3633_v43 = vld [vmem:[%s4879_s30 + $0xb4] sm:$0xf] }
  0xe0   : > { %2942 = vmatmul.mubr.bf16.gmra.mrb[92].mxu1 %v5451_v47  ;;  %v1119_v47 = vshll.u32 %v4676_v38, 16  ;;  %v1291_v40 = vsel %vm794_vm1, %v1289_v17, %v1290_v60  ;;  %v1600_v24 = vshrl.u32 %v5702_v14, 16  ;;  %v1607_v9 = vshll.u32 %v5561_v18, 16  ;;  %v4686_v17 = vld [vmem:[%s4879_s30 + $0xa4] ss:$0 sps:$4 sm:$0x11]  }
  0xe1   : > { %2949 = vmatprep.mubr.bf16.mxu1 %v1574_v28  ;;  %v3602_v28 = vld [vmem:[%s4879_s30 + $0x90] sm:$0xe]  ;;  %v1598_v62 = vsel %vm537_vm0, %v1593_v10, %v1597_v7  ;;  %v5718_v63 = vcombine.low %v3631_v23, %v5580_v1  ;;  %v1138_v32 = vshll.u32 %v5224_v42, 16  ;;  %v1133_v52 = vrot.slane %v1131_v45, 1  ;;  %v4733_v1 = vld [vmem:[%s4879_s30 + $0xa0] sm:$0xf] }
  0xe2   : > { %v1121_v38 = vrot.slane %v1119_v47, 1  ;;  %v3762_v41 = vcombine.low %v3602_v28, %v4732_v0  ;;  %v3603_v47 = vld [vmem:[%s4879_s30 + $0x9c] sm:$0xe]  ;;  %v1293_v33 = vrot.slane %v4683_v51, 1  ;;  %v5731_v28 = vcombine.low %v3633_v43, %v5594_v35 }
  0xe3   : > { %v1614_v18 = vshll.u32 %v5718_v63, 16  ;;  %v3763_v21 = vcombine.low %v3603_v47, %v4733_v1  ;;  %v1612_v7 = vshrl.u32 %v5718_v63, 16  ;;  %v1619_v23 = vshll.u32 %v5572_v34, 16  ;;  %v5743_v34 = vld [vmem:[%s6115_s2] ss:$0 sm:$0xff] }
  0xe4   : > { %v1122_v15 = vsel %vm537_vm0, %v1117_v8, %v1121_v38  ;;  %v1136_v8 = vshrl.u32 %v5224_v42, 16  ;;  %v1143_v38 = vshll.u32 %v4683_v51, 16  ;;  %v3604_v42 = vld [vmem:[%s4879_s30 + $0xa8] sm:$0xe]  ;;  %v1296_v45 = vrot.slane %v4686_v17, 1 }
  0xe5   : > { %v1295_v35 = vrot.slane %v3763_v21, 1  ;;  %v1626_v0 = vshll.u32 %v5731_v28, 16  ;;  %v1621_v51 = vrot.slane %v1619_v23, 1  ;;  %v3635_v47 = vld [vmem:[%s4879_s30 + $0xc0] sm:$0xf] }
  0xe6   : > { %2789 = vmatmul.mubr.bf16.gmra.mrb[96].mxu0 %v1110_v31  ;;  %v1604_v31 = vrot.slane %v1602_v6, 1  ;;  %v1616_v6 = vrot.slane %v1614_v18, 1  ;;  %v5751_v18 = vld [vmem:[%s4879_s30 + $0xb0] ss:$0 sps:$4 sm:$0x11]  }
  0xe7   : > { %2796 = vmatprep.mubr.bf16.mxu0 %v1288_v59  ;;  %v1292_v59 = vrot.slane %v3762_v41, 1 }
  0xe8   : > { %2950 = vmatmul.mubr.bf16.gmra.mrb[96].mxu1 %v5479_v30  ;;  %v1128_v30 = vrot.slane %v1126_v16, 1  ;;  %v1605_v37 = vor.u32 %v1604_v31, %v1600_v24  ;;  %v4734_v24 = vld [vmem:[%s4879_s30 + $0xac] sm:$0xf] }
  0xe9   : > { %2957 = vmatprep.mubr.bf16.mxu1 %v1586_v25  ;;  %v1609_v25 = vrot.slane %v1607_v9, 1  ;;  %v1294_v60 = vsel %vm794_vm1, %v1292_v59, %v1293_v33  ;;  %v1148_v9 = vshrl.u32 %v5240_v27, 16 }
  0xea   : > { %v1129_v57 = vor.u32 %v1128_v30, %v1124_v46  ;;  %v1145_v30 = vrot.slane %v1143_v38, 1 }
  0xeb   : > { %v1610_v10 = vsel %vm537_vm0, %v1605_v37, %v1609_v25  ;;  %v1297_v37 = vsel %vm794_vm1, %v1295_v35, %v1296_v45  ;;  %v1155_v25 = vshll.u32 %v4686_v17, 16  ;;  %v1162_v17 = vshll.u32 %v5258_v55, 16 }
  0xec   : > { %v1134_v16 = vsel %vm537_vm0, %v1129_v57, %v1133_v52 }
  0xee   : > { %2797 = vmatmul.mubr.bf16.gmra.mrb[100].mxu0 %v1122_v15  ;;  %v1150_v15 = vshll.u32 %v5240_v27, 16  ;;  %v1631_v27 = vshll.u32 %v5583_v20, 16 }
  0xef   : > { %2804 = vmatprep.mubr.bf16.mxu0 %v1291_v40  ;;  %v1617_v40 = vor.u32 %v1616_v6, %v1612_v7  ;;  %v5758_v7 = vcombine.low %v3635_v47, %v5627_v29  ;;  %v1299_v29 = vrot.slane %v5751_v18, 1 }
  0xf0   : > { %2958 = vmatmul.mubr.bf16.gmra.mrb[100].mxu1 %v5613_v39  ;;  %v1140_v39 = vrot.slane %v1138_v32, 1  ;;  %v1152_v32 = vrot.slane %v1150_v15, 1  ;;  %v1633_v45 = vrot.slane %v1631_v27, 1 }
  0xf1   : > { %2965 = vmatprep.mubr.bf16.mxu1 %v1598_v62 }
  0xf2   : > { %v1141_v46 = vor.u32 %v1140_v39, %v1136_v8  ;;  %v1628_v8 = vrot.slane %v1626_v0, 1  ;;  %v1153_v23 = vor.u32 %v1152_v32, %v1148_v9  ;;  %v3637_v9 = vld [vmem:[%s4879_s30 + $0xcc] sm:$0xf] }
  0xf4   : > { %v1146_v33 = vsel %vm537_vm0, %v1141_v46, %v1145_v30  ;;  %v1157_v30 = vrot.slane %v1155_v25, 1 }
  0xf6   : > { %2805 = vmatmul.mubr.bf16.gmra.mrb[104].mxu0 %v1134_v16  ;;  %v1624_v16 = vshrl.u32 %v5731_v28, 16 }
  0xf7   : > { %2812 = vmatprep.mubr.bf16.mxu0 %v1294_v60 }
  0xf8   : > { %2966 = vmatmul.mubr.bf16.gmra.mrb[104].mxu1 %v5683_v48  ;;  %v3764_v48 = vcombine.low %v3604_v42, %v4734_v24  ;;  %v3605_v42 = vld [vmem:[%s4879_s30 + $0xb4] sm:$0xe]  ;;  %v1629_v35 = vor.u32 %v1628_v8, %v1624_v16  ;;  %v1643_v16 = vshll.u32 %v5640_v61, 16 }
  0xf9   : > { %2973 = vmatprep.mubr.bf16.mxu1 %v1610_v10  ;;  %v3915_v41 = vpop.f32.mrb[0].mxu0  ;;  %v1622_v10 = vsel %vm537_vm0, %v1617_v40, %v1621_v51  ;;  %v1638_v40 = vshll.u32 %v5758_v7, 16  ;;  %v4735_v51 = vld [vmem:[%s4879_s30 + $0xb8] sm:$0xf] }
  0xfa   : > { %v3916_v62 = vpop.f32.mrb[1].mxu0  ;;  %v1298_v15 = vrot.slane %v3764_v48, 1  ;;  %v3765_v24 = vcombine.low %v3605_v42, %v4735_v51  ;;  %v1172_v51 = vshrl.u32 %v5275_v56, 16 }
  0xfb   : > { %v4027_v31 = vpop.f32.mrb[0].mxu1  ;;  %v3917_v57 = vadd.f32 %v3916_v62, %v3915_v41  ;;  %v3918_v52 = vpop.f32.mrb[2].mxu0 }
  0xfc   : > { %v4028_v59 = vpop.f32.mrb[1].mxu1  ;;  %v3919_v43 = vpop.f32.mrb[3].mxu0  ;;  %v1301_v42 = vrot.slane %v3765_v24, 1 }
  0xfd   : > { %v4029_v1 = vadd.f32 %v4028_v59, %v4027_v31  ;;  %v4030_v21 = vpop.f32.mrb[2].mxu1  ;;  %v2405_v39 = vadd.f32 %v3917_v57, %v5743_v34  ;;  %v3920_v38 = vadd.f32 %v3919_v43, %v3918_v52  ;;  %v1164_v31 = vrot.slane %v1162_v17, 1 }
  0xfe   : > { %v4031_v60 = vpop.f32.mrb[3].mxu1  ;;  %2813 = vmatmul.mubr.bf16.gmra.mrb[108].mxu0 %v1146_v33  ;;  %v1158_v52 = vsel %vm537_vm0, %v1153_v23, %v1157_v30  ;;  %v1300_v59 = vsel %vm794_vm1, %v1298_v15, %v1299_v29  ;;  %v1167_v33 = vshll.u32 %v5751_v18, 16  ;;  %v1174_v18 = vshll.u32 %v5275_v56, 16  ;;  %v4716_v15 = vld [vmem:[%s6116_s3] sm:$0xff]  }
  0xff   : > { %v4032_v6 = vadd.f32 %v4031_v60, %v4030_v21  ;;  %v2408_v46 = vadd.f32 %v3920_v38, %v5743_v34  ;;  %v5763_v20 = vadd.f32 %v4029_v1, %v2405_v39  ;;  %2820 = vmatprep.mubr.bf16.mxu0 %v1297_v37  ;;  %v5777_v37 = vld [vmem:[%s4879_s30 + $0xbc] ss:$0 sps:$4 sm:$0x11]   ;;  %v1634_v21 = vsel %vm537_vm0, %v1629_v35, %v1633_v45 }
 0x100   : > { %2974 = vmatmul.mubr.bf16.gmra.mrb[108].mxu1 %v5702_v14  ;;  %v1160_v14 = vshrl.u32 %v5258_v55, 16  ;;  %v1636_v55 = vshrl.u32 %v5758_v7, 16  ;;  %v1640_v38 = vrot.slane %v1638_v40, 1  ;;  %v5784_v60 = vcombine.low %v3637_v9, %v5648_v4  ;;  %v3606_v4 = vld [vmem:[%s4879_s30 + $0xc0] sm:$0xe]  ;;  %4443 = vmatprep.subr.bf16.mxu1 %v4716_v15 }
 0x101   : > { %2981 = vmatprep.mubr.bf16.mxu1 %v1622_v10  ;;  %v5767_v0 = vadd.f32 %v4032_v6, %v2408_v46  ;;  %v3921_v41 = vpop.f32.mrb[4].mxu0  ;;  %v1169_v23 = vrot.slane %v1167_v33, 1  ;;  %v1302_v46 = vrot.slane %v5777_v37, 1  ;;  %v1645_v45 = vrot.slane %v1643_v16, 1  ;;  %4444 = vmatpush3.bf16.msra.mxu1 %v4716_v15 }
 0x102   : > { %v3922_v48 = vpop.f32.mrb[5].mxu0  ;;  %v1165_v61 = vor.u32 %v1164_v31, %v1160_v14  ;;  %v1641_v35 = vor.u32 %v1640_v38, %v1636_v55  ;;  %v1655_v56 = vshll.u32 %v5660_v22, 16 }
 0x103   : > { %v4033_v62 = vpop.f32.mrb[4].mxu1  ;;  %v3923_v32 = vadd.f32 %v3922_v48, %v3921_v41  ;;  %v3924_v47 = vpop.f32.mrb[6].mxu0  ;;  %v1176_v48 = vrot.slane %v1174_v18, 1 }
 0x104   : > { %v4034_v57 = vpop.f32.mrb[5].mxu1  ;;  %v3925_v25 = vpop.f32.mrb[7].mxu0  ;;  %v1646_v16 = vsel %vm537_vm0, %v1641_v35, %v1645_v45  ;;  %v1184_v35 = vshrl.u32 %v5294_v49, 16 }
 0x105   : > { %v4035_v43 = vadd.f32 %v4034_v57, %v4033_v62  ;;  %v4036_v1 = vpop.f32.mrb[6].mxu1  ;;  %v2413_v8 = vadd.f32 %v3923_v32, %v5743_v34  ;;  %v3926_v27 = vadd.f32 %v3925_v25, %v3924_v47  ;;  %v4736_v62 = vld [vmem:[%s4879_s30 + $0xc4] sm:$0xf]  ;;  %v1170_v32 = vsel %vm537_vm0, %v1165_v61, %v1169_v23  ;;  %v4697_v57 = vld [vmem:[%s4879_s30 + $0xc8] ss:$0 sps:$4 sm:$0x11]  }
 0x106   : > { %v4037_v39 = vpop.f32.mrb[7].mxu1  ;;  %2821 = vmatmul.mubr.bf16.gmra.mrb[112].mxu0 %v1158_v52  ;;  %v3766_v14 = vcombine.low %v3606_v4, %v4736_v62  ;;  %v1179_v47 = vshll.u32 %v5777_v37, 16  ;;  %v1303_v25 = vsel %vm794_vm1, %v1301_v42, %v1302_v46  ;;  %v1177_v22 = vor.u32 %v1176_v48, %v1172_v51  ;;  %v3655_v42 = vld [vmem:[%s4879_s30 + $0x18] sm:$0xe] }
 0x107   : > { %v4038_v10 = vadd.f32 %v4037_v39, %v4036_v1  ;;  %v2416_v17 = vadd.f32 %v3926_v27, %v5743_v34  ;;  %v5788_v6 = vadd.f32 %v4035_v43, %v2413_v8  ;;  %2828 = vmatprep.mubr.bf16.mxu0 %v1300_v59  ;;  %v1648_v43 = vshrl.u32 %v5784_v60, 16 }
 0x108   : > { %2982 = vmatmul.mubr.bf16.gmra.mrb[112].mxu1 %v5718_v63  ;;  %v1650_v63 = vshll.u32 %v5784_v60, 16  ;;  %v1186_v27 = vshll.u32 %v5294_v49, 16  ;;  %v1181_v18 = vrot.slane %v1179_v47, 1  ;;  %v1657_v4 = vrot.slane %v1655_v56, 1  ;;  %v4717_v56 = vld [vmem:[%s6116_s3 + $0x8] sm:$0xff]  }
 0x109   : > { %2989 = vmatprep.mubr.bf16.mxu1 %v1634_v21  ;;  %v5796_v30 = vadd.f32 %v4038_v10, %v2416_v17  ;;  %v3927_v29 = vpop.f32.mrb[8].mxu0  ;;  %v1304_v10 = vrot.slane %v3766_v14, 1  ;;  %v1305_v17 = vrot.slane %v4697_v57, 1  ;;  %v1191_v51 = vshll.u32 %v4697_v57, 16  ;;  %4445 = vmatprep.subr.bf16.mxu1 %v4717_v56 }
 0x10a   : > { %v3928_v41 = vpop.f32.mrb[9].mxu0  ;;  %v1652_v8 = vrot.slane %v1650_v63, 1  ;;  %4446 = vmatpush3.bf16.msra.mxu1 %v4717_v56 }
 0x10b   : > { %v4039_v40 = vpop.f32.mrb[8].mxu1  ;;  %v3929_v24 = vadd.f32 %v3928_v41, %v3927_v29  ;;  %v3930_v31 = vpop.f32.mrb[10].mxu0  ;;  %v1182_v41 = vsel %vm537_vm0, %v1177_v22, %v1181_v18 }
 0x10c   : > { %v4040_v9 = vpop.f32.mrb[9].mxu1  ;;  %v3931_v52 = vpop.f32.mrb[11].mxu0  ;;  %v1653_v15 = vor.u32 %v1652_v8, %v1648_v43  ;;  %v1193_v43 = vrot.slane %v1191_v51, 1  ;;  %v4740_v51 = vld [vmem:[%s4879_s30 + $0x2c] ss:$0 sps:$4 sm:$0x11]  }
 0x10d   : > { %v4041_v59 = vadd.f32 %v4040_v9, %v4039_v40  ;;  %v4042_v33 = vpop.f32.mrb[10].mxu1  ;;  %v2421_v1 = vadd.f32 %v3929_v24, %v5743_v34  ;;  %v3932_v21 = vadd.f32 %v3931_v52, %v3930_v31  ;;  %v1188_v40 = vrot.slane %v1186_v27, 1  ;;  %v4737_v31 = vld [vmem:[%s4879_s30 + $0x1c] sm:$0xf] }
 0x10e   : > { %v4043_v55 = vpop.f32.mrb[11].mxu1  ;;  %2829 = vmatmul.mubr.bf16.gmra.mrb[116].mxu0 %v1170_v32  ;;  %v1306_v24 = vsel %vm794_vm1, %v1304_v10, %v1305_v17  ;;  %v3799_v9 = vcombine.low %v3655_v42, %v4737_v31  ;;  %v1658_v52 = vsel %vm537_vm0, %v1653_v15, %v1657_v4  ;;  %v4739_v17 = vld [vmem:[%s4879_s30 + $0x28] sm:$0xf] }
 0x10f   : > { %v4044_v37 = vadd.f32 %v4043_v55, %v4042_v33  ;;  %v2424_v39 = vadd.f32 %v3932_v21, %v5743_v34  ;;  %v5811_v38 = vadd.f32 %v4041_v59, %v2421_v1  ;;  %2836 = vmatprep.mubr.bf16.mxu0 %v1303_v25  ;;  %v1189_v25 = vor.u32 %v1188_v40, %v1184_v35  ;;  %v4738_v21 = vld [vmem:[%s4879_s30 + $0x20] ss:$0 sps:$4 sm:$0x11]  }
 0x110   : > { %2990 = vmatmul.mubr.bf16.gmra.mrb[116].mxu1 %v5731_v28  ;;  %v1723_v1 = vrot.slane %v3799_v9, 1  ;;  %v1724_v55 = vrot.slane %v4738_v21, 1 }
 0x111   : > { %2997 = vmatprep.mubr.bf16.mxu1 %v1646_v16  ;;  %v5814_v61 = vadd.f32 %v4044_v37, %v2424_v39  ;;  %v3933_v23 = vpop.f32.mrb[12].mxu0  ;;  %v3656_v16 = vld [vmem:[%s4879_s30 + $0x24] sm:$0xe]  ;;  %v1194_v10 = vsel %vm537_vm0, %v1189_v25, %v1193_v43 }
 0x112   : > { %v3934_v46 = vpop.f32.mrb[13].mxu0 }
 0x113   : > { %v4045_v29 = vpop.f32.mrb[12].mxu1  ;;  %v3935_v45 = vadd.f32 %v3934_v46, %v3933_v23  ;;  %v3936_v63 = vpop.f32.mrb[14].mxu0  ;;  %v3800_v23 = vcombine.low %v3656_v16, %v4739_v17  ;;  %v1725_v46 = vsel %vm794_vm1, %v1723_v1, %v1724_v55  ;;  %v4718_v55 = vld [vmem:[%s6116_s3 + $0x10] sm:$0xff]  }
 0x114   : > { %v4046_v28 = vpop.f32.mrb[13].mxu1  ;;  %v3937_v48 = vpop.f32.mrb[15].mxu0  ;;  %4447 = vmatprep.subr.bf16.mxu1 %v4718_v55 }
 0x115   : > { %v4047_v62 = vadd.f32 %v4046_v28, %v4045_v29  ;;  %v4048_v14 = vpop.f32.mrb[14].mxu1  ;;  %v2429_v32 = vadd.f32 %v3935_v45, %v5743_v34  ;;  %v3938_v47 = vadd.f32 %v3937_v48, %v3936_v63  ;;  %v1726_v40 = vrot.slane %v3800_v23, 1  ;;  %4448 = vmatpush3.bf16.msra.mxu1 %v4718_v55 }
 0x116   : > { %v4049_v49 = vpop.f32.mrb[15].mxu1  ;;  %2837 = vmatmul.mubr.bf16.gmra.mrb[120].mxu0 %v1182_v41  ;;  %v1727_v48 = vrot.slane %v4740_v51, 1 }
 0x117   : > { %v4050_v59 = vadd.f32 %v4049_v49, %v4048_v14  ;;  %v2432_v33 = vadd.f32 %v3938_v47, %v5743_v34  ;;  %v5824_v57 = vadd.f32 %v4047_v62, %v2429_v32  ;;  %2844 = vmatprep.mubr.bf16.mxu0 %v1306_v24 }
 0x118   : > { %2998 = vmatmul.mubr.bf16.gmra.mrb[120].mxu1 %v5758_v7  ;;  %v1728_v49 = vsel %vm794_vm1, %v1726_v40, %v1727_v48 }
 0x119   : > { %3005 = vmatprep.mubr.bf16.mxu1 %v1658_v52  ;;  %v5832_v8 = vadd.f32 %v4050_v59, %v2432_v33  ;;  %v3939_v27 = vpop.f32.mrb[16].mxu0 }
 0x11a   : > { %v3940_v37 = vpop.f32.mrb[17].mxu0 }
 0x11b   : > { %v4051_v39 = vpop.f32.mrb[16].mxu1  ;;  %v3941_v7 = vadd.f32 %v3940_v37, %v3939_v27  ;;  %v3942_v22 = vpop.f32.mrb[18].mxu0 }
 0x11c   : > { %v4052_v18 = vpop.f32.mrb[17].mxu1  ;;  %v3943_v15 = vpop.f32.mrb[19].mxu0 }
 0x11d   : > { %v4053_v4 = vadd.f32 %v4052_v18, %v4051_v39  ;;  %v4054_v42 = vpop.f32.mrb[18].mxu1  ;;  %v2437_v29 = vadd.f32 %v3941_v7, %v5743_v34  ;;  %v3944_v35 = vadd.f32 %v3943_v15, %v3942_v22 }
 0x11e   : > { %v4055_v45 = vpop.f32.mrb[19].mxu1  ;;  %2845 = vmatmul.mubr.bf16.gmra.mrb[124].mxu0 %v1194_v10 }
 0x11f   : > { %v4056_v63 = vadd.f32 %v4055_v45, %v4054_v42  ;;  %v2440_v28 = vadd.f32 %v3944_v35, %v5743_v34  ;;  %v5839_v41 = vadd.f32 %v4053_v4, %v2437_v29  ;;  %4411 = vmatprep.mubr.bf16.mxu0 %v1725_v46 }
 0x120   : > { %3006 = vmatmul.mubr.bf16.gmra.mrb[124].mxu1 %v5784_v60 }
 0x121   : > { %v5843_v62 = vadd.f32 %v4056_v63, %v2440_v28  ;;  %v3945_v14 = vpop.f32.mrb[20].mxu0 }
 0x122   : > { %v3946_v24 = vpop.f32.mrb[21].mxu0 }
 0x123   : > { %v4057_v31 = vpop.f32.mrb[20].mxu1  ;;  %v3947_v9 = vadd.f32 %v3946_v24, %v3945_v14  ;;  %v3948_v32 = vpop.f32.mrb[22].mxu0 }
 0x124   : > { %v4058_v47 = vpop.f32.mrb[21].mxu1  ;;  %v3949_v52 = vpop.f32.mrb[23].mxu0 }
 0x125   : > { %v4059_v59 = vadd.f32 %v4058_v47, %v4057_v31  ;;  %v4060_v33 = vpop.f32.mrb[22].mxu1  ;;  %v2445_v25 = vadd.f32 %v3947_v9, %v5743_v34  ;;  %v3950_v60 = vadd.f32 %v3949_v52, %v3948_v32  ;;  %v4719_v52 = vld [vmem:[%s6116_s3 + $0x18] sm:$0xff]  }
 0x126   : > { %v4061_v43 = vpop.f32.mrb[23].mxu1  ;;  %4412 = vmatmul.mubr.bf16.vlgmr.msra.gmra.mrb[128].mxu0 %v1728_v49  ;;  %4449 = vmatprep.subr.bf16.mxu1 %v4719_v52 }
 0x127   : > { %v4062_v56 = vadd.f32 %v4061_v43, %v4060_v33  ;;  %v2448_v1 = vadd.f32 %v3950_v60, %v5743_v34  ;;  %v5848_v21 = vadd.f32 %v4059_v59, %v2445_v25  ;;  %4415 = vmatprep.mubr.bf16.mxu0 %v5541_v26  ;;  %4450 = vmatpush3.bf16.msra.mxu1 %v4719_v52 }
 0x129   : > { %v5854_v16 = vadd.f32 %v4062_v56, %v2448_v1  ;;  %v3951_v27 = vpop.f32.mrb[24].mxu0 }
 0x12a   : > { %v3952_v37 = vpop.f32.mrb[25].mxu0 }
 0x12b   : > { %v4063_v39 = vpop.f32.mrb[24].mxu1  ;;  %v3953_v7 = vadd.f32 %v3952_v37, %v3951_v27  ;;  %v3954_v22 = vpop.f32.mrb[26].mxu0 }
 0x12c   : > { %v4064_v18 = vpop.f32.mrb[25].mxu1  ;;  %v3955_v10 = vpop.f32.mrb[27].mxu0 }
 0x12d   : > { %v4065_v17 = vadd.f32 %v4064_v18, %v4063_v39  ;;  %v4066_v23 = vpop.f32.mrb[26].mxu1  ;;  %v2453_v15 = vadd.f32 %v3953_v7, %v5743_v34  ;;  %v3956_v26 = vadd.f32 %v3955_v10, %v3954_v22 }
 0x12e   : > { %v4067_v4 = vpop.f32.mrb[27].mxu1  ;;  %4416 = vmatmul.mubr.bf16.gmra.mrb[132].mxu0 %v5552_v3 }
 0x12f   : > { %v4068_v42 = vadd.f32 %v4067_v4, %v4066_v23  ;;  %v2456_v46 = vadd.f32 %v3956_v26, %v5743_v34  ;;  %v5859_v29 = vadd.f32 %v4065_v17, %v2453_v15  ;;  %4419 = vmatprep.mubr.bf16.mxu0 %v5564_v13 }
 0x131   : > { %v5862_v35 = vadd.f32 %v4068_v42, %v2456_v46  ;;  %v3957_v45 = vpop.f32.mrb[28].mxu0 }
 0x132   : > { %v3958_v63 = vpop.f32.mrb[29].mxu0 }
 0x133   : > { %v4069_v28 = vpop.f32.mrb[28].mxu1  ;;  %v3959_v40 = vadd.f32 %v3958_v63, %v3957_v45  ;;  %v3960_v51 = vpop.f32.mrb[30].mxu0 }
 0x134   : > { %v4070_v48 = vpop.f32.mrb[29].mxu1  ;;  %v3961_v14 = vpop.f32.mrb[31].mxu0 }
 0x135   : > { %v4071_v24 = vadd.f32 %v4070_v48, %v4069_v28  ;;  %v4072_v31 = vpop.f32.mrb[30].mxu1  ;;  %v2461_v9 = vadd.f32 %v3959_v40, %v5743_v34  ;;  %v3962_v3 = vadd.f32 %v3961_v14, %v3960_v51  ;;  %v4720_v14 = vld [vmem:[%s6116_s3 + $0x20] sm:$0xff]  }
 0x136   : > { %v4073_v32 = vpop.f32.mrb[31].mxu1  ;;  %4420 = vmatmul.mubr.bf16.gmra.mrb[136].mxu0 %v5575_v5  ;;  %4451 = vmatprep.subr.bf16.mxu1 %v4720_v14 }
 0x137   : > { %v4074_v47 = vadd.f32 %v4073_v32, %v4072_v31  ;;  %v2464_v13 = vadd.f32 %v3962_v3, %v5743_v34  ;;  %v5867_v49 = vadd.f32 %v4071_v24, %v2461_v9  ;;  %4423 = vmatprep.mubr.bf16.mxu0 %v5597_v36  ;;  %4452 = vmatpush3.bf16.msra.mxu1 %v4720_v14 }
 0x139   : > { %v5873_v59 = vadd.f32 %v4074_v47, %v2464_v13  ;;  %v3963_v33 = vpop.f32.mrb[32].mxu0 }
 0x13a   : > { %v3964_v25 = vpop.f32.mrb[33].mxu0 }
 0x13b   : > { %v4075_v60 = vpop.f32.mrb[32].mxu1  ;;  %v3965_v43 = vadd.f32 %v3964_v25, %v3963_v33  ;;  %v3966_v56 = vpop.f32.mrb[34].mxu0 }
 0x13c   : > { %v4076_v5 = vpop.f32.mrb[33].mxu1  ;;  %v3967_v1 = vpop.f32.mrb[35].mxu0 }
 0x13d   : > { %v4077_v55 = vadd.f32 %v4076_v5, %v4075_v60  ;;  %v4078_v27 = vpop.f32.mrb[34].mxu1  ;;  %v2469_v37 = vadd.f32 %v3965_v43, %v5743_v34  ;;  %v3968_v36 = vadd.f32 %v3967_v1, %v3966_v56 }
 0x13e   : > { %v4079_v39 = vpop.f32.mrb[35].mxu1  ;;  %4424 = vmatmul.mubr.bf16.gmra.mrb[140].mxu0 %v5602_v12 }
 0x13f   : > { %v4080_v7 = vadd.f32 %v4079_v39, %v4078_v27  ;;  %v2472_v22 = vadd.f32 %v3968_v36, %v5743_v34  ;;  %v5878_v18 = vadd.f32 %v4077_v55, %v2469_v37  ;;  %4427 = vmatprep.mubr.bf16.mxu0 %v5605_v53 }
 0x141   : > { %v5881_v10 = vadd.f32 %v4080_v7, %v2472_v22  ;;  %v3969_v17 = vpop.f32.mrb[36].mxu0 }
 0x142   : > { %v3970_v23 = vpop.f32.mrb[37].mxu0 }
 0x143   : > { %v4081_v15 = vpop.f32.mrb[36].mxu1  ;;  %v3971_v26 = vadd.f32 %v3970_v23, %v3969_v17  ;;  %v3972_v4 = vpop.f32.mrb[38].mxu0 }
 0x144   : > { %v4082_v42 = vpop.f32.mrb[37].mxu1  ;;  %v3973_v46 = vpop.f32.mrb[39].mxu0 }
 0x145   : > { %v4083_v45 = vadd.f32 %v4082_v42, %v4081_v15  ;;  %v4084_v63 = vpop.f32.mrb[38].mxu1  ;;  %v2477_v28 = vadd.f32 %v3971_v26, %v5743_v34  ;;  %v3974_v12 = vadd.f32 %v3973_v46, %v3972_v4  ;;  %v4721_v46 = vld [vmem:[%s6116_s3 + $0x28] sm:$0xff]  }
 0x146   : > { %v4085_v40 = vpop.f32.mrb[39].mxu1  ;;  %4428 = vmatmul.mubr.bf16.gmra.mrb[144].mxu0 %v5609_v44  ;;  %4453 = vmatprep.subr.bf16.mxu1 %v4721_v46 }
 0x147   : > { %v4086_v51 = vadd.f32 %v4085_v40, %v4084_v63  ;;  %v2480_v53 = vadd.f32 %v3974_v12, %v5743_v34  ;;  %v5886_v48 = vadd.f32 %v4083_v45, %v2477_v28  ;;  %4431 = vmatprep.mubr.bf16.mxu0 %v5616_v54  ;;  %4454 = vmatpush3.bf16.msra.mxu1 %v4721_v46 }
 0x149   : > { %v5892_v24 = vadd.f32 %v4086_v51, %v2480_v53  ;;  %v3975_v31 = vpop.f32.mrb[40].mxu0 }
 0x14a   : > { %v3976_v9 = vpop.f32.mrb[41].mxu0 }
 0x14b   : > { %v4087_v3 = vpop.f32.mrb[40].mxu1  ;;  %v3977_v32 = vadd.f32 %v3976_v9, %v3975_v31  ;;  %v3978_v47 = vpop.f32.mrb[42].mxu0 }
 0x14c   : > { %v4088_v44 = vpop.f32.mrb[41].mxu1  ;;  %v3979_v13 = vpop.f32.mrb[43].mxu0 }
 0x14d   : > { %v4089_v52 = vadd.f32 %v4088_v44, %v4087_v3  ;;  %v4090_v33 = vpop.f32.mrb[42].mxu1  ;;  %v2485_v25 = vadd.f32 %v3977_v32, %v5743_v34  ;;  %v3980_v54 = vadd.f32 %v3979_v13, %v3978_v47 }
 0x14e   : > { %v4091_v60 = vpop.f32.mrb[43].mxu1  ;;  %4432 = vmatmul.mubr.bf16.gmra.mrb[148].mxu0 %v5630_v2 }
 0x14f   : > { %v4092_v43 = vadd.f32 %v4091_v60, %v4090_v33  ;;  %v2488_v56 = vadd.f32 %v3980_v54, %v5743_v34  ;;  %v5897_v5 = vadd.f32 %v4089_v52, %v2485_v25  ;;  %4435 = vmatprep.mubr.bf16.mxu0 %v5651_v11 }
 0x151   : > { %v5900_v1 = vadd.f32 %v4092_v43, %v2488_v56  ;;  %v3981_v55 = vpop.f32.mrb[44].mxu0 }
 0x152   : > { %v3982_v27 = vpop.f32.mrb[45].mxu0 }
 0x153   : > { %v4093_v37 = vpop.f32.mrb[44].mxu1  ;;  %v3983_v36 = vadd.f32 %v3982_v27, %v3981_v55  ;;  %v3984_v39 = vpop.f32.mrb[46].mxu0 }
 0x154   : > { %v4094_v7 = vpop.f32.mrb[45].mxu1  ;;  %v3985_v22 = vpop.f32.mrb[47].mxu0 }
 0x155   : > { %v4095_v17 = vadd.f32 %v4094_v7, %v4093_v37  ;;  %v4096_v23 = vpop.f32.mrb[46].mxu1  ;;  %v2493_v15 = vadd.f32 %v3983_v36, %v5743_v34  ;;  %v3986_v2 = vadd.f32 %v3985_v22, %v3984_v39 }
 0x156   : > { %v4097_v26 = vpop.f32.mrb[47].mxu1  ;;  %4436 = vmatmul.mubr.bf16.gmra.mrb[152].mxu0 %v5663_v19 }
 0x157   : > { %v4098_v4 = vadd.f32 %v4097_v26, %v4096_v23  ;;  %v2496_v11 = vadd.f32 %v3986_v2, %v5743_v34  ;;  %v5905_v42 = vadd.f32 %v4095_v17, %v2493_v15  ;;  %4439 = vmatprep.mubr.bf16.mxu0 %v5679_v58  ;;  %v4722_v17 = vld [vmem:[%s6116_s3 + $0x30] sm:$0xff]  }
 0x158   : > { %4455 = vmatprep.subr.bf16.mxu1 %v4722_v17 }
 0x159   : > { %v5911_v45 = vadd.f32 %v4098_v4, %v2496_v11  ;;  %v3987_v63 = vpop.f32.mrb[48].mxu0  ;;  %4456 = vmatpush3.bf16.msra.mxu1 %v4722_v17 }
 0x15a   : > { %v3988_v28 = vpop.f32.mrb[49].mxu0 }
 0x15b   : > { %v4099_v12 = vpop.f32.mrb[48].mxu1  ;;  %v3989_v40 = vadd.f32 %v3988_v28, %v3987_v63  ;;  %v3990_v51 = vpop.f32.mrb[50].mxu0 }
 0x15c   : > { %v4100_v19 = vpop.f32.mrb[49].mxu1  ;;  %v3991_v53 = vpop.f32.mrb[51].mxu0 }
 0x15d   : > { %v4101_v14 = vadd.f32 %v4100_v19, %v4099_v12  ;;  %v4102_v31 = vpop.f32.mrb[50].mxu1  ;;  %v2501_v9 = vadd.f32 %v3989_v40, %v5743_v34  ;;  %v3992_v58 = vadd.f32 %v3991_v53, %v3990_v51 }
 0x15e   : > { %v4103_v3 = vpop.f32.mrb[51].mxu1  ;;  %4440 = vmatmul.mubr.bf16.gmra.mrb[156].mxu0 %v5686_v50 }
 0x15f   : > { %v4104_v32 = vadd.f32 %v4103_v3, %v4102_v31  ;;  %v2504_v47 = vadd.f32 %v3992_v58, %v5743_v34  ;;  %v5916_v44 = vadd.f32 %v4101_v14, %v2501_v9 }
 0x161   : > { %v5918_v13 = vadd.f32 %v4104_v32, %v2504_v47  ;;  %v3993_v52 = vpop.f32.mrb[52].mxu0 }
 0x162   : > { %v3994_v33 = vpop.f32.mrb[53].mxu0 }
 0x163   : > { %v4105_v25 = vpop.f32.mrb[52].mxu1  ;;  %v3995_v54 = vadd.f32 %v3994_v33, %v3993_v52  ;;  %v3996_v60 = vpop.f32.mrb[54].mxu0 }
 0x164   : > { %v4106_v43 = vpop.f32.mrb[53].mxu1  ;;  %v3997_v56 = vpop.f32.mrb[55].mxu0 }
 0x165   : > { %v4107_v55 = vadd.f32 %v4106_v43, %v4105_v25  ;;  %v4108_v27 = vpop.f32.mrb[54].mxu1  ;;  %v2509_v37 = vadd.f32 %v3995_v54, %v5743_v34  ;;  %v3998_v36 = vadd.f32 %v3997_v56, %v3996_v60 }
 0x166   : > { %v4109_v39 = vpop.f32.mrb[55].mxu1 }
 0x167   : > { %v4110_v50 = vadd.f32 %v4109_v39, %v4108_v27  ;;  %v2512_v7 = vadd.f32 %v3998_v36, %v5743_v34  ;;  %v5922_v22 = vadd.f32 %v4107_v55, %v2509_v37  ;;  %v4723_v39 = vld [vmem:[%s6116_s3 + $0x38] sm:$0xff]  }
 0x168   : > { %4457 = vmatprep.subr.bf16.mxu1 %v4723_v39 }
 0x169   : > { %v5927_v23 = vadd.f32 %v4110_v50, %v2512_v7  ;;  %v3999_v15 = vpop.f32.mrb[56].mxu0  ;;  %4458 = vmatpush3.bf16.msra.mxu1 %v4723_v39 }
 0x16a   : > { %v4000_v2 = vpop.f32.mrb[57].mxu0 }
 0x16b   : > { %v4111_v26 = vpop.f32.mrb[56].mxu1  ;;  %v4001_v4 = vadd.f32 %v4000_v2, %v3999_v15  ;;  %v4002_v11 = vpop.f32.mrb[58].mxu0 }
 0x16c   : > { %v4112_v46 = vpop.f32.mrb[57].mxu1  ;;  %v4003_v63 = vpop.f32.mrb[59].mxu0 }
 0x16d   : > { %v4113_v28 = vadd.f32 %v4112_v46, %v4111_v26  ;;  %v4114_v12 = vpop.f32.mrb[58].mxu1  ;;  %v2517_v40 = vadd.f32 %v4001_v4, %v5743_v34  ;;  %v4004_v51 = vadd.f32 %v4003_v63, %v4002_v11 }
 0x16e   : > { %v4115_v19 = vpop.f32.mrb[59].mxu1 }
 0x16f   : > { %v4116_v53 = vadd.f32 %v4115_v19, %v4114_v12  ;;  %v2520_v14 = vadd.f32 %v4004_v51, %v5743_v34  ;;  %v5931_v31 = vadd.f32 %v4113_v28, %v2517_v40 }
 0x171   : > { %v5933_v9 = vadd.f32 %v4116_v53, %v2520_v14  ;;  %v4005_v58 = vpop.f32.mrb[60].mxu0 }
 0x172   : > { %v4006_v3 = vpop.f32.mrb[61].mxu0 }
 0x173   : > { %v4117_v32 = vpop.f32.mrb[60].mxu1  ;;  %v4007_v47 = vadd.f32 %v4006_v3, %v4005_v58  ;;  %v4008_v52 = vpop.f32.mrb[62].mxu0 }
 0x174   : > { %v4118_v33 = vpop.f32.mrb[61].mxu1  ;;  %v4009_v25 = vpop.f32.mrb[63].mxu0 }
 0x175   : > { %v4119_v54 = vadd.f32 %v4118_v33, %v4117_v32  ;;  %v4120_v60 = vpop.f32.mrb[62].mxu1  ;;  %v2525_v43 = vadd.f32 %v4007_v47, %v5743_v34  ;;  %v4010_v56 = vadd.f32 %v4009_v25, %v4008_v52 }
 0x176   : > { %v4121_v55 = vpop.f32.mrb[63].mxu1 }
 0x177   : > { %v4122_v27 = vadd.f32 %v4121_v55, %v4120_v60  ;;  %v2528_v37 = vadd.f32 %v4010_v56, %v5743_v34  ;;  %v5937_v36 = vadd.f32 %v4119_v54, %v2525_v43 }
 0x179   : > { %v5942_v50 = vadd.f32 %v4122_v27, %v2528_v37  ;;  %v4139_v7 = vpop.f32.mrb[64].mxu0 }
 0x17a   : > { %v4140_v17 = vpop.f32.mrb[65].mxu0 }
 0x17b   : > { %v4251_v15 = vpop.f32.mrb[64].mxu1  ;;  %v4141_v2 = vadd.f32 %v4140_v17, %v4139_v7  ;;  %v4142_v26 = vpop.f32.mrb[66].mxu0 }
 0x17c   : > { %v4252_v4 = vpop.f32.mrb[65].mxu1  ;;  %v4143_v11 = vpop.f32.mrb[67].mxu0 }
 0x17d   : > { %v4253_v46 = vadd.f32 %v4252_v4, %v4251_v15  ;;  %v4254_v63 = vpop.f32.mrb[66].mxu1  ;;  %v2727_v34 = vadd.f32 %v4141_v2, %v5763_v20  ;;  %v4144_v28 = vadd.f32 %v4143_v11, %v4142_v26 }
 0x17e   : > { %v4255_v12 = vpop.f32.mrb[67].mxu1 }
 0x17f   : > { %v4256_v40 = vadd.f32 %v4255_v12, %v4254_v63  ;;  %v2730_v51 = vadd.f32 %v4144_v28, %v5767_v0  ;;  %v5946_v19 = vadd.f32 %v4253_v46, %v2727_v34 }
 0x181   : > { %v4145_v53 = vpop.f32.mrb[68].mxu0  ;;  %v5948_v14 = vadd.f32 %v4256_v40, %v2730_v51 }
 0x182   : > { %v4146_v58 = vpop.f32.mrb[69].mxu0 }
 0x183   : > { %v4257_v3 = vpop.f32.mrb[68].mxu1  ;;  %v4147_v32 = vadd.f32 %v4146_v58, %v4145_v53  ;;  %v4148_v47 = vpop.f32.mrb[70].mxu0 }
 0x184   : > { %v4258_v52 = vpop.f32.mrb[69].mxu1  ;;  %v4149_v33 = vpop.f32.mrb[71].mxu0 }
 0x185   : > { %v4259_v25 = vadd.f32 %v4258_v52, %v4257_v3  ;;  %v4260_v54 = vpop.f32.mrb[70].mxu1  ;;  %v2735_v20 = vadd.f32 %v4147_v32, %v5788_v6  ;;  %v4150_v60 = vadd.f32 %v4149_v33, %v4148_v47 }
 0x186   : > { %v4261_v43 = vpop.f32.mrb[71].mxu1 }
 0x187   : > { %v4262_v56 = vadd.f32 %v4261_v43, %v4260_v54  ;;  %v2738_v0 = vadd.f32 %v4150_v60, %v5796_v30  ;;  %v5952_v55 = vadd.f32 %v4259_v25, %v2735_v20 }
 0x189   : > { %v4151_v27 = vpop.f32.mrb[72].mxu0  ;;  %v5954_v37 = vadd.f32 %v4262_v56, %v2738_v0 }
 0x18a   : > { %v4152_v39 = vpop.f32.mrb[73].mxu0 }
 0x18b   : > { %v4263_v7 = vpop.f32.mrb[72].mxu1  ;;  %v4153_v17 = vadd.f32 %v4152_v39, %v4151_v27  ;;  %v4154_v15 = vpop.f32.mrb[74].mxu0 }
 0x18c   : > { %v4264_v2 = vpop.f32.mrb[73].mxu1  ;;  %v4155_v26 = vpop.f32.mrb[75].mxu0 }
 0x18d   : > { %v4265_v4 = vadd.f32 %v4264_v2, %v4263_v7  ;;  %v4266_v11 = vpop.f32.mrb[74].mxu1  ;;  %v2743_v6 = vadd.f32 %v4153_v17, %v5811_v38  ;;  %v4156_v46 = vadd.f32 %v4155_v26, %v4154_v15 }
 0x18e   : > { %v4267_v63 = vpop.f32.mrb[75].mxu1 }
 0x18f   : > { %v4268_v34 = vadd.f32 %v4267_v63, %v4266_v11  ;;  %v2746_v30 = vadd.f32 %v4156_v46, %v5814_v61  ;;  %v5958_v28 = vadd.f32 %v4265_v4, %v2743_v6 }
 0x191   : > { %v4157_v12 = vpop.f32.mrb[76].mxu0  ;;  %v5960_v40 = vadd.f32 %v4268_v34, %v2746_v30 }
 0x192   : > { %v4158_v51 = vpop.f32.mrb[77].mxu0 }
 0x193   : > { %v4269_v53 = vpop.f32.mrb[76].mxu1  ;;  %v4159_v58 = vadd.f32 %v4158_v51, %v4157_v12  ;;  %v4160_v3 = vpop.f32.mrb[78].mxu0 }
 0x194   : > { %v4270_v32 = vpop.f32.mrb[77].mxu1  ;;  %v4161_v47 = vpop.f32.mrb[79].mxu0 }
 0x195   : > { %v4271_v52 = vadd.f32 %v4270_v32, %v4269_v53  ;;  %v4272_v33 = vpop.f32.mrb[78].mxu1  ;;  %v2751_v38 = vadd.f32 %v4159_v58, %v5824_v57  ;;  %v4162_v25 = vadd.f32 %v4161_v47, %v4160_v3 }
 0x196   : > { %v4273_v54 = vpop.f32.mrb[79].mxu1 }
 0x197   : > { %v4274_v20 = vadd.f32 %v4273_v54, %v4272_v33  ;;  %v2754_v61 = vadd.f32 %v4162_v25, %v5832_v8  ;;  %v5964_v60 = vadd.f32 %v4271_v52, %v2751_v38 }
 0x199   : > { %v4163_v43 = vpop.f32.mrb[80].mxu0  ;;  %v5966_v56 = vadd.f32 %v4274_v20, %v2754_v61 }
 0x19a   : > { %v4164_v0 = vpop.f32.mrb[81].mxu0 }
 0x19b   : > { %v4275_v27 = vpop.f32.mrb[80].mxu1  ;;  %v4165_v39 = vadd.f32 %v4164_v0, %v4163_v43  ;;  %v4166_v7 = vpop.f32.mrb[82].mxu0 }
 0x19c   : > { %v4276_v17 = vpop.f32.mrb[81].mxu1  ;;  %v4167_v15 = vpop.f32.mrb[83].mxu0 }
 0x19d   : > { %v4277_v2 = vadd.f32 %v4276_v17, %v4275_v27  ;;  %v4278_v26 = vpop.f32.mrb[82].mxu1  ;;  %v2759_v57 = vadd.f32 %v4165_v39, %v5839_v41  ;;  %v4168_v4 = vadd.f32 %v4167_v15, %v4166_v7 }
 0x19e   : > { %v4279_v11 = vpop.f32.mrb[83].mxu1 }
 0x19f   : > { %v4280_v6 = vadd.f32 %v4279_v11, %v4278_v26  ;;  %v2762_v8 = vadd.f32 %v4168_v4, %v5843_v62  ;;  %v5970_v46 = vadd.f32 %v4277_v2, %v2759_v57 }
 0x1a1   : > { %v4169_v63 = vpop.f32.mrb[84].mxu0  ;;  %v5972_v34 = vadd.f32 %v4280_v6, %v2762_v8 }
 0x1a2   : > { %v4170_v30 = vpop.f32.mrb[85].mxu0 }
 0x1a3   : > { %v4281_v12 = vpop.f32.mrb[84].mxu1  ;;  %v4171_v51 = vadd.f32 %v4170_v30, %v4169_v63  ;;  %v4172_v53 = vpop.f32.mrb[86].mxu0 }
 0x1a4   : > { %v4282_v58 = vpop.f32.mrb[85].mxu1  ;;  %v4173_v3 = vpop.f32.mrb[87].mxu0 }
 0x1a5   : > { %v4283_v32 = vadd.f32 %v4282_v58, %v4281_v12  ;;  %v4284_v47 = vpop.f32.mrb[86].mxu1  ;;  %v2767_v41 = vadd.f32 %v4171_v51, %v5848_v21  ;;  %v4174_v52 = vadd.f32 %v4173_v3, %v4172_v53 }
 0x1a6   : > { %v4285_v33 = vpop.f32.mrb[87].mxu1 }
 0x1a7   : > { %v4286_v38 = vadd.f32 %v4285_v33, %v4284_v47  ;;  %v2770_v62 = vadd.f32 %v4174_v52, %v5854_v16  ;;  %v5976_v25 = vadd.f32 %v4283_v32, %v2767_v41 }
 0x1a9   : > { %v4175_v54 = vpop.f32.mrb[88].mxu0  ;;  %v5978_v20 = vadd.f32 %v4286_v38, %v2770_v62 }
 0x1aa   : > { %v4176_v61 = vpop.f32.mrb[89].mxu0 }
 0x1ab   : > { %v4287_v43 = vpop.f32.mrb[88].mxu1  ;;  %v4177_v0 = vadd.f32 %v4176_v61, %v4175_v54  ;;  %v4178_v27 = vpop.f32.mrb[90].mxu0 }
 0x1ac   : > { %v4288_v39 = vpop.f32.mrb[89].mxu1  ;;  %v4179_v7 = vpop.f32.mrb[91].mxu0 }
 0x1ad   : > { %v4289_v17 = vadd.f32 %v4288_v39, %v4287_v43  ;;  %v4290_v15 = vpop.f32.mrb[90].mxu1  ;;  %v2775_v21 = vadd.f32 %v4177_v0, %v5859_v29  ;;  %v4180_v2 = vadd.f32 %v4179_v7, %v4178_v27 }
 0x1ae   : > { %v4291_v26 = vpop.f32.mrb[91].mxu1 }
 0x1af   : > { %v4292_v57 = vadd.f32 %v4291_v26, %v4290_v15  ;;  %v2778_v16 = vadd.f32 %v4180_v2, %v5862_v35  ;;  %v5982_v4 = vadd.f32 %v4289_v17, %v2775_v21 }
 0x1b1   : > { %v4181_v11 = vpop.f32.mrb[92].mxu0  ;;  %v5984_v6 = vadd.f32 %v4292_v57, %v2778_v16 }
 0x1b2   : > { %v4182_v8 = vpop.f32.mrb[93].mxu0 }
 0x1b3   : > { %v4293_v63 = vpop.f32.mrb[92].mxu1  ;;  %v4183_v30 = vadd.f32 %v4182_v8, %v4181_v11  ;;  %v4184_v12 = vpop.f32.mrb[94].mxu0 }
 0x1b4   : > { %v4294_v51 = vpop.f32.mrb[93].mxu1  ;;  %v4185_v53 = vpop.f32.mrb[95].mxu0 }
 0x1b5   : > { %v4295_v58 = vadd.f32 %v4294_v51, %v4293_v63  ;;  %v4296_v3 = vpop.f32.mrb[94].mxu1  ;;  %v2783_v29 = vadd.f32 %v4183_v30, %v5867_v49  ;;  %v4186_v32 = vadd.f32 %v4185_v53, %v4184_v12 }
 0x1b6   : > { %v4297_v47 = vpop.f32.mrb[95].mxu1 }
 0x1b7   : > { %v4298_v41 = vadd.f32 %v4297_v47, %v4296_v3  ;;  %v2786_v35 = vadd.f32 %v4186_v32, %v5873_v59  ;;  %v5988_v52 = vadd.f32 %v4295_v58, %v2783_v29 }
 0x1b9   : > { %v4187_v33 = vpop.f32.mrb[96].mxu0  ;;  %v5990_v38 = vadd.f32 %v4298_v41, %v2786_v35 }
 0x1ba   : > { %v4188_v62 = vpop.f32.mrb[97].mxu0 }
 0x1bb   : > { %v4299_v54 = vpop.f32.mrb[96].mxu1  ;;  %v4189_v61 = vadd.f32 %v4188_v62, %v4187_v33  ;;  %v4190_v43 = vpop.f32.mrb[98].mxu0 }
 0x1bc   : > { %v4300_v0 = vpop.f32.mrb[97].mxu1  ;;  %v4191_v27 = vpop.f32.mrb[99].mxu0 }
 0x1bd   : > { %v4301_v39 = vadd.f32 %v4300_v0, %v4299_v54  ;;  %v4302_v7 = vpop.f32.mrb[98].mxu1  ;;  %v2791_v49 = vadd.f32 %v4189_v61, %v5878_v18  ;;  %v4192_v17 = vadd.f32 %v4191_v27, %v4190_v43 }
 0x1be   : > { %v4303_v15 = vpop.f32.mrb[99].mxu1 }
 0x1bf   : > { %v4304_v21 = vadd.f32 %v4303_v15, %v4302_v7  ;;  %v2794_v59 = vadd.f32 %v4192_v17, %v5881_v10  ;;  %v5994_v2 = vadd.f32 %v4301_v39, %v2791_v49 }
 0x1c1   : > { %v4193_v26 = vpop.f32.mrb[100].mxu0  ;;  %v5996_v57 = vadd.f32 %v4304_v21, %v2794_v59 }
 0x1c2   : > { %v4194_v16 = vpop.f32.mrb[101].mxu0 }
 0x1c3   : > { %v4305_v11 = vpop.f32.mrb[100].mxu1  ;;  %v4195_v8 = vadd.f32 %v4194_v16, %v4193_v26  ;;  %v4196_v63 = vpop.f32.mrb[102].mxu0 }
 0x1c4   : > { %v4306_v30 = vpop.f32.mrb[101].mxu1  ;;  %v4197_v12 = vpop.f32.mrb[103].mxu0 }
 0x1c5   : > { %v4307_v51 = vadd.f32 %v4306_v30, %v4305_v11  ;;  %v4308_v53 = vpop.f32.mrb[102].mxu1  ;;  %v2799_v18 = vadd.f32 %v4195_v8, %v5886_v48  ;;  %v4198_v58 = vadd.f32 %v4197_v12, %v4196_v63 }
 0x1c6   : > { %v4309_v3 = vpop.f32.mrb[103].mxu1 }
 0x1c7   : > { %v4310_v29 = vadd.f32 %v4309_v3, %v4308_v53  ;;  %v2802_v10 = vadd.f32 %v4198_v58, %v5892_v24  ;;  %v6000_v32 = vadd.f32 %v4307_v51, %v2799_v18 }
 0x1c9   : > { %v4199_v47 = vpop.f32.mrb[104].mxu0  ;;  %v6002_v41 = vadd.f32 %v4310_v29, %v2802_v10 }
 0x1ca   : > { %v4200_v35 = vpop.f32.mrb[105].mxu0 }
 0x1cb   : > { %v4311_v33 = vpop.f32.mrb[104].mxu1  ;;  %v4201_v62 = vadd.f32 %v4200_v35, %v4199_v47  ;;  %v4202_v54 = vpop.f32.mrb[106].mxu0 }
 0x1cc   : > { %v4312_v61 = vpop.f32.mrb[105].mxu1  ;;  %v4203_v43 = vpop.f32.mrb[107].mxu0 }
 0x1cd   : > { %v4313_v0 = vadd.f32 %v4312_v61, %v4311_v33  ;;  %v4314_v27 = vpop.f32.mrb[106].mxu1  ;;  %v2807_v48 = vadd.f32 %v4201_v62, %v5897_v5  ;;  %v4204_v39 = vadd.f32 %v4203_v43, %v4202_v54 }
 0x1ce   : > { %v4315_v7 = vpop.f32.mrb[107].mxu1 }
 0x1cf   : > { %v4316_v49 = vadd.f32 %v4315_v7, %v4314_v27  ;;  %v2810_v24 = vadd.f32 %v4204_v39, %v5900_v1  ;;  %v6006_v17 = vadd.f32 %v4313_v0, %v2807_v48 }
 0x1d1   : > { %v4205_v15 = vpop.f32.mrb[108].mxu0  ;;  %v6008_v21 = vadd.f32 %v4316_v49, %v2810_v24 }
 0x1d2   : > { %v4206_v59 = vpop.f32.mrb[109].mxu0 }
 0x1d3   : > { %v4317_v26 = vpop.f32.mrb[108].mxu1  ;;  %v4207_v16 = vadd.f32 %v4206_v59, %v4205_v15  ;;  %v4208_v11 = vpop.f32.mrb[110].mxu0 }
 0x1d4   : > { %v4318_v8 = vpop.f32.mrb[109].mxu1  ;;  %v4209_v63 = vpop.f32.mrb[111].mxu0 }
 0x1d5   : > { %v4319_v30 = vadd.f32 %v4318_v8, %v4317_v26  ;;  %v4320_v12 = vpop.f32.mrb[110].mxu1  ;;  %v2815_v5 = vadd.f32 %v4207_v16, %v5905_v42  ;;  %v4210_v51 = vadd.f32 %v4209_v63, %v4208_v11 }
 0x1d6   : > { %v4321_v53 = vpop.f32.mrb[111].mxu1 }
 0x1d7   : > { %v4322_v18 = vadd.f32 %v4321_v53, %v4320_v12  ;;  %v2818_v1 = vadd.f32 %v4210_v51, %v5911_v45  ;;  %v6012_v58 = vadd.f32 %v4319_v30, %v2815_v5 }
 0x1d9   : > { %v4211_v3 = vpop.f32.mrb[112].mxu0  ;;  %v6014_v29 = vadd.f32 %v4322_v18, %v2818_v1 }
 0x1da   : > { %v4212_v10 = vpop.f32.mrb[113].mxu0 }
 0x1db   : > { %v4323_v47 = vpop.f32.mrb[112].mxu1  ;;  %v4213_v35 = vadd.f32 %v4212_v10, %v4211_v3  ;;  %v4214_v33 = vpop.f32.mrb[114].mxu0 }
 0x1dc   : > { %v4324_v62 = vpop.f32.mrb[113].mxu1  ;;  %v4215_v54 = vpop.f32.mrb[115].mxu0 }
 0x1dd   : > { %v4325_v61 = vadd.f32 %v4324_v62, %v4323_v47  ;;  %v4326_v43 = vpop.f32.mrb[114].mxu1  ;;  %v2823_v42 = vadd.f32 %v4213_v35, %v5916_v44  ;;  %v4216_v0 = vadd.f32 %v4215_v54, %v4214_v33 }
 0x1de   : > { %v4327_v27 = vpop.f32.mrb[115].mxu1 }
 0x1df   : > { %v4328_v48 = vadd.f32 %v4327_v27, %v4326_v43  ;;  %v2826_v45 = vadd.f32 %v4216_v0, %v5918_v13  ;;  %v6018_v39 = vadd.f32 %v4325_v61, %v2823_v42 }
 0x1e1   : > { %v4217_v7 = vpop.f32.mrb[116].mxu0  ;;  %v6020_v49 = vadd.f32 %v4328_v48, %v2826_v45 }
 0x1e2   : > { %v4218_v24 = vpop.f32.mrb[117].mxu0 }
 0x1e3   : > { %v4329_v15 = vpop.f32.mrb[116].mxu1  ;;  %v4219_v59 = vadd.f32 %v4218_v24, %v4217_v7  ;;  %v4220_v26 = vpop.f32.mrb[118].mxu0 }
 0x1e4   : > { %v4330_v16 = vpop.f32.mrb[117].mxu1  ;;  %v4221_v11 = vpop.f32.mrb[119].mxu0 }
 0x1e5   : > { %v4331_v8 = vadd.f32 %v4330_v16, %v4329_v15  ;;  %v4332_v63 = vpop.f32.mrb[118].mxu1  ;;  %v2831_v44 = vadd.f32 %v4219_v59, %v5922_v22  ;;  %v4222_v30 = vadd.f32 %v4221_v11, %v4220_v26 }
 0x1e6   : > { %v4333_v12 = vpop.f32.mrb[119].mxu1 }
 0x1e7   : > { %v4334_v5 = vadd.f32 %v4333_v12, %v4332_v63  ;;  %v2834_v13 = vadd.f32 %v4222_v30, %v5927_v23  ;;  %v6024_v51 = vadd.f32 %v4331_v8, %v2831_v44 }
 0x1e9   : > { %v4223_v53 = vpop.f32.mrb[120].mxu0  ;;  %v6026_v18 = vadd.f32 %v4334_v5, %v2834_v13 }
 0x1ea   : > { %v4224_v1 = vpop.f32.mrb[121].mxu0 }
 0x1eb   : > { %v4335_v3 = vpop.f32.mrb[120].mxu1  ;;  %v4225_v10 = vadd.f32 %v4224_v1, %v4223_v53  ;;  %v4226_v47 = vpop.f32.mrb[122].mxu0 }
 0x1ec   : > { %v4336_v35 = vpop.f32.mrb[121].mxu1  ;;  %v4227_v33 = vpop.f32.mrb[123].mxu0 }
 0x1ed   : > { %v4337_v62 = vadd.f32 %v4336_v35, %v4335_v3  ;;  %v4338_v54 = vpop.f32.mrb[122].mxu1  ;;  %v2839_v22 = vadd.f32 %v4225_v10, %v5931_v31  ;;  %v4228_v61 = vadd.f32 %v4227_v33, %v4226_v47 }
 0x1ee   : > { %v4339_v43 = vpop.f32.mrb[123].mxu1 }
 0x1ef   : > { %v4340_v42 = vadd.f32 %v4339_v43, %v4338_v54  ;;  %v2842_v23 = vadd.f32 %v4228_v61, %v5933_v9  ;;  %v6030_v0 = vadd.f32 %v4337_v62, %v2839_v22 }
 0x1f1   : > { %v4229_v27 = vpop.f32.mrb[124].mxu0  ;;  %v6032_v48 = vadd.f32 %v4340_v42, %v2842_v23 }
 0x1f2   : > { %v4230_v45 = vpop.f32.mrb[125].mxu0 }
 0x1f3   : > { %v4341_v7 = vpop.f32.mrb[124].mxu1  ;;  %v4231_v24 = vadd.f32 %v4230_v45, %v4229_v27  ;;  %v4232_v15 = vpop.f32.mrb[126].mxu0 }
 0x1f4   : > { %v4342_v59 = vpop.f32.mrb[125].mxu1  ;;  %v4233_v26 = vpop.f32.mrb[127].mxu0 }
 0x1f5   : > { %v4343_v16 = vadd.f32 %v4342_v59, %v4341_v7  ;;  %v4344_v11 = vpop.f32.mrb[126].mxu1  ;;  %v2847_v31 = vadd.f32 %v4231_v24, %v5937_v36  ;;  %v4234_v8 = vadd.f32 %v4233_v26, %v4232_v15 }
 0x1f6   : > { %v4345_v63 = vpop.f32.mrb[127].mxu1 }
 0x1f7   : > { %v4346_v44 = vadd.f32 %v4345_v63, %v4344_v11  ;;  %v2850_v9 = vadd.f32 %v4234_v8, %v5942_v50  ;;  %v6036_v30 = vadd.f32 %v4343_v16, %v2847_v31 }
 0x1f9   : > { %v4413_v12 = vpop.f32.mrb[128].mxu0  ;;  %v6038_v5 = vadd.f32 %v4346_v44, %v2850_v9 }
 0x1fa   : > { %v3057_v13 = vadd.f32 %v4413_v12, %v5952_v55  ;;  %v3048_v53 = vpop.f32.mrb[129].mxu0 }
 0x1fb   : > { %v3049_v1 = vadd.f32 %v3048_v53, %v5946_v19  ;;  %v4414_v3 = vpop.f32.mrb[130].mxu0 }
 0x1fc   : > { %v3060_v10 = vadd.f32 %v4414_v3, %v5954_v37  ;;  %v3051_v47 = vpop.f32.mrb[131].mxu0  ;;  %v3177_v35 = vmax.f32 %v3057_v13, 0.0 }
 0x1fd   : > { %v3052_v36 = vadd.f32 %v3051_v47, %v5948_v14  ;;  %v3175_v62 = vmax.f32 %v3049_v1, 0.0 }
 0x1fe   : > { %v3178_v33 = vmax.f32 %v3060_v10, 0.0 }
 0x1ff   : > { %v3176_v50 = vmax.f32 %v3052_v36, 0.0 }
 0x200   : > { %v3208_v54 = vpack.c.bf16 %v3178_v33, %v3177_v35 }
 0x201   : > { %v3207_v22 = vpack.c.bf16 %v3176_v50, %v3175_v62  ;;  %v4417_v61 = vpop.f32.mrb[132].mxu0 }
 0x202   : > { %v3073_v43 = vadd.f32 %v4417_v61, %v5964_v60  ;;  %v3064_v42 = vpop.f32.mrb[133].mxu0 }
 0x203   : > { %v3065_v55 = vadd.f32 %v3064_v42, %v5958_v28  ;;  %v4418_v23 = vpop.f32.mrb[134].mxu0  ;;  %4459 = vmatprep.mubr.bf16.mxu1 %v3207_v22 }
 0x204   : > { %v3076_v19 = vadd.f32 %v4418_v23, %v5966_v56  ;;  %v3067_v37 = vpop.f32.mrb[135].mxu0  ;;  %4460 = vmatmul.mubr.bf16.vlgmr.msra.gmra.mrb[128].mxu1 %v3208_v54  ;;  %v3181_v27 = vmax.f32 %v3073_v43, 0.0 }
 0x205   : > { %v3068_v14 = vadd.f32 %v3067_v37, %v5960_v40  ;;  %v3179_v7 = vmax.f32 %v3065_v55, 0.0 }
 0x206   : > { %v3182_v45 = vmax.f32 %v3076_v19, 0.0 }
 0x207   : > { %v3180_v24 = vmax.f32 %v3068_v14, 0.0 }
 0x208   : > { %v3210_v15 = vpack.c.bf16 %v3182_v45, %v3181_v27 }
 0x209   : > { %v3209_v59 = vpack.c.bf16 %v3180_v24, %v3179_v7  ;;  %v4421_v26 = vpop.f32.mrb[136].mxu0 }
 0x20a   : > { %v3089_v60 = vadd.f32 %v4421_v26, %v5976_v25  ;;  %v3080_v16 = vpop.f32.mrb[137].mxu0 }
 0x20b   : > { %v3081_v28 = vadd.f32 %v3080_v16, %v5970_v46  ;;  %v4422_v11 = vpop.f32.mrb[138].mxu0  ;;  %4463 = vmatprep.mubr.bf16.mxu1 %v3209_v59 }
 0x20c   : > { %v3092_v56 = vadd.f32 %v4422_v11, %v5978_v20  ;;  %v3083_v31 = vpop.f32.mrb[139].mxu0  ;;  %4464 = vmatmul.mubr.bf16.gmra.mrb[132].mxu1 %v3210_v15  ;;  %v3185_v8 = vmax.f32 %v3089_v60, 0.0 }
 0x20d   : > { %v3084_v40 = vadd.f32 %v3083_v31, %v5972_v34  ;;  %v3183_v44 = vmax.f32 %v3081_v28, 0.0 }
 0x20e   : > { %v3186_v63 = vmax.f32 %v3092_v56, 0.0 }
 0x20f   : > { %v3184_v9 = vmax.f32 %v3084_v40, 0.0 }
 0x210   : > { %v3212_v12 = vpack.c.bf16 %v3186_v63, %v3185_v8 }
 0x211   : > { %v3211_v13 = vpack.c.bf16 %v3184_v9, %v3183_v44  ;;  %v4425_v53 = vpop.f32.mrb[140].mxu0 }
 0x212   : > { %v3105_v25 = vadd.f32 %v4425_v53, %v5988_v52  ;;  %v3096_v1 = vpop.f32.mrb[141].mxu0 }
 0x213   : > { %v3097_v46 = vadd.f32 %v3096_v1, %v5982_v4  ;;  %v4426_v3 = vpop.f32.mrb[142].mxu0  ;;  %4467 = vmatprep.mubr.bf16.mxu1 %v3211_v13 }
 0x214   : > { %v3108_v20 = vadd.f32 %v4426_v3, %v5990_v38  ;;  %v3099_v10 = vpop.f32.mrb[143].mxu0  ;;  %4468 = vmatmul.mubr.bf16.gmra.mrb[136].mxu1 %v3212_v12  ;;  %v3189_v47 = vmax.f32 %v3105_v25, 0.0 }
 0x215   : > { %v3100_v34 = vadd.f32 %v3099_v10, %v5984_v6  ;;  %v3187_v35 = vmax.f32 %v3097_v46, 0.0 }
 0x216   : > { %v3190_v36 = vmax.f32 %v3108_v20, 0.0 }
 0x217   : > { %v3188_v33 = vmax.f32 %v3100_v34, 0.0 }
 0x218   : > { %v3214_v62 = vpack.c.bf16 %v3190_v36, %v3189_v47 }
 0x219   : > { %v3213_v50 = vpack.c.bf16 %v3188_v33, %v3187_v35  ;;  %v4429_v54 = vpop.f32.mrb[144].mxu0 }
 0x21a   : > { %v3121_v52 = vadd.f32 %v4429_v54, %v6000_v32  ;;  %v3112_v22 = vpop.f32.mrb[145].mxu0 }
 0x21b   : > { %v3113_v4 = vadd.f32 %v3112_v22, %v5994_v2  ;;  %v4430_v61 = vpop.f32.mrb[146].mxu0  ;;  %4471 = vmatprep.mubr.bf16.mxu1 %v3213_v50 }
 0x21c   : > { %v3124_v38 = vadd.f32 %v4430_v61, %v6002_v41  ;;  %v3115_v43 = vpop.f32.mrb[147].mxu0  ;;  %4472 = vmatmul.mubr.bf16.gmra.mrb[140].mxu1 %v3214_v62  ;;  %v3193_v42 = vmax.f32 %v3121_v52, 0.0 }
 0x21d   : > { %v3116_v6 = vadd.f32 %v3115_v43, %v5996_v57  ;;  %v3191_v23 = vmax.f32 %v3113_v4, 0.0 }
 0x21e   : > { %v3194_v55 = vmax.f32 %v3124_v38, 0.0 }
 0x21f   : > { %v3192_v19 = vmax.f32 %v3116_v6, 0.0 }
 0x220   : > { %v3216_v37 = vpack.c.bf16 %v3194_v55, %v3193_v42 }
 0x221   : > { %v3215_v14 = vpack.c.bf16 %v3192_v19, %v3191_v23  ;;  %v4433_v27 = vpop.f32.mrb[148].mxu0 }
 0x222   : > { %v3137_v32 = vadd.f32 %v4433_v27, %v6012_v58  ;;  %v3128_v45 = vpop.f32.mrb[149].mxu0 }
 0x223   : > { %v3129_v2 = vadd.f32 %v3128_v45, %v6006_v17  ;;  %v4434_v7 = vpop.f32.mrb[150].mxu0  ;;  %4475 = vmatprep.mubr.bf16.mxu1 %v3215_v14 }
 0x224   : > { %v3140_v41 = vadd.f32 %v4434_v7, %v6014_v29  ;;  %v3131_v24 = vpop.f32.mrb[151].mxu0  ;;  %4476 = vmatmul.mubr.bf16.gmra.mrb[144].mxu1 %v3216_v37  ;;  %v3197_v15 = vmax.f32 %v3137_v32, 0.0 }
 0x225   : > { %v3132_v57 = vadd.f32 %v3131_v24, %v6008_v21  ;;  %v3195_v26 = vmax.f32 %v3129_v2, 0.0 }
 0x226   : > { %v3198_v59 = vmax.f32 %v3140_v41, 0.0 }
 0x227   : > { %v3196_v60 = vmax.f32 %v3132_v57, 0.0 }
 0x228   : > { %v3218_v16 = vpack.c.bf16 %v3198_v59, %v3197_v15 }
 0x229   : > { %v3217_v28 = vpack.c.bf16 %v3196_v60, %v3195_v26  ;;  %v4437_v11 = vpop.f32.mrb[152].mxu0 }
 0x22a   : > { %v3153_v58 = vadd.f32 %v4437_v11, %v6024_v51  ;;  %v3144_v56 = vpop.f32.mrb[153].mxu0 }
 0x22b   : > { %v3145_v17 = vadd.f32 %v3144_v56, %v6018_v39  ;;  %v4438_v31 = vpop.f32.mrb[154].mxu0  ;;  %4479 = vmatprep.mubr.bf16.mxu1 %v3217_v28 }
 0x22c   : > { %v3156_v29 = vadd.f32 %v4438_v31, %v6026_v18  ;;  %v3147_v40 = vpop.f32.mrb[155].mxu0  ;;  %4480 = vmatmul.mubr.bf16.gmra.mrb[148].mxu1 %v3218_v16  ;;  %v3201_v8 = vmax.f32 %v3153_v58, 0.0 }
 0x22d   : > { %v3148_v21 = vadd.f32 %v3147_v40, %v6020_v49  ;;  %v3199_v44 = vmax.f32 %v3145_v17, 0.0 }
 0x22e   : > { %v3202_v63 = vmax.f32 %v3156_v29, 0.0 }
 0x22f   : > { %v3200_v9 = vmax.f32 %v3148_v21, 0.0 }
 0x230   : > { %v3220_v12 = vpack.c.bf16 %v3202_v63, %v3201_v8 }
 0x231   : > { %v3219_v13 = vpack.c.bf16 %v3200_v9, %v3199_v44  ;;  %v4441_v53 = vpop.f32.mrb[156].mxu0 }
 0x232   : > { %v3169_v51 = vadd.f32 %v4441_v53, %v6036_v30  ;;  %v3160_v25 = vpop.f32.mrb[157].mxu0 }
 0x233   : > { %v3161_v39 = vadd.f32 %v3160_v25, %v6030_v0  ;;  %v4442_v1 = vpop.f32.mrb[158].mxu0  ;;  %4483 = vmatprep.mubr.bf16.mxu1 %v3219_v13 }
 0x234   : > { %v3172_v18 = vadd.f32 %v4442_v1, %v6038_v5  ;;  %v3163_v46 = vpop.f32.mrb[159].mxu0  ;;  %4484 = vmatmul.mubr.bf16.gmra.mrb[152].mxu1 %v3220_v12  ;;  %v3205_v3 = vmax.f32 %v3169_v51, 0.0 }
 0x235   : > { %v3164_v49 = vadd.f32 %v3163_v46, %v6032_v48  ;;  %v3203_v10 = vmax.f32 %v3161_v39, 0.0 }
 0x236   : > { %v3206_v20 = vmax.f32 %v3172_v18, 0.0 }
 0x237   : > { %v3204_v34 = vmax.f32 %v3164_v49, 0.0 }
 0x238   : > { %v3222_v47 = vpack.c.bf16 %v3206_v20, %v3205_v3 }
 0x239   : > { %v3221_v36 = vpack.c.bf16 %v3204_v34, %v3203_v10 }
 0x23b   : > { %4487 = vmatprep.mubr.bf16.mxu1 %v3221_v36 }
 0x23c   : > { %4488 = vmatmul.mubr.bf16.gmra.mrb[156].mxu1 %v3222_v47 }
 0x2d7   : > { %v4461_v0 = vpop.f32.mrb[128].mxu1 }
 0x2d8   : > { %3450 = vst [vmem:[%s6076_s21 + $0x10] sm:$0xff] %v4461_v0  ;;  %v3321_v48 = vpop.f32.mrb[129].mxu1 }
 0x2d9   : > { %3448 = vst [vmem:[%s6076_s21] sm:$0xff] %v3321_v48  ;;  %v4462_v30 = vpop.f32.mrb[130].mxu1 }
 0x2da   : > { %3451 = vst [vmem:[%s6076_s21 + $0x18] sm:$0xff] %v4462_v30  ;;  %v3324_v5 = vpop.f32.mrb[131].mxu1 }
 0x2db   : > { %3449 = vst [vmem:[%s6076_s21 + $0x8] sm:$0xff] %v3324_v5 }
 0x2df   : > { %v4465_v35 = vpop.f32.mrb[132].mxu1 }
 0x2e0   : > { %3454 = vst [vmem:[%s6076_s21 + $0x30] sm:$0xff] %v4465_v35  ;;  %v3337_v33 = vpop.f32.mrb[133].mxu1 }
 0x2e1   : > { %3452 = vst [vmem:[%s6076_s21 + $0x20] sm:$0xff] %v3337_v33  ;;  %v4466_v62 = vpop.f32.mrb[134].mxu1 }
 0x2e2   : > { %3455 = vst [vmem:[%s6076_s21 + $0x38] sm:$0xff] %v4466_v62  ;;  %v3340_v50 = vpop.f32.mrb[135].mxu1 }
 0x2e3   : > { %3453 = vst [vmem:[%s6076_s21 + $0x28] sm:$0xff] %v3340_v50 }
 0x2e7   : > { %v4469_v54 = vpop.f32.mrb[136].mxu1 }
 0x2e8   : > { %3458 = vst [vmem:[%s6076_s21 + $0x50] sm:$0xff] %v4469_v54  ;;  %v3353_v52 = vpop.f32.mrb[137].mxu1 }
 0x2e9   : > { %3456 = vst [vmem:[%s6076_s21 + $0x40] sm:$0xff] %v3353_v52  ;;  %v4470_v22 = vpop.f32.mrb[138].mxu1 }
 0x2ea   : > { %3459 = vst [vmem:[%s6076_s21 + $0x58] sm:$0xff] %v4470_v22  ;;  %v3356_v4 = vpop.f32.mrb[139].mxu1 }
 0x2eb   : > { %3457 = vst [vmem:[%s6076_s21 + $0x48] sm:$0xff] %v3356_v4 }
 0x2ef   : > { %v4473_v61 = vpop.f32.mrb[140].mxu1 }
 0x2f0   : > { %3462 = vst [vmem:[%s6076_s21 + $0x70] sm:$0xff] %v4473_v61  ;;  %v3369_v38 = vpop.f32.mrb[141].mxu1 }
 0x2f1   : > { %3460 = vst [vmem:[%s6076_s21 + $0x60] sm:$0xff] %v3369_v38  ;;  %v4474_v43 = vpop.f32.mrb[142].mxu1 }
 0x2f2   : > { %3463 = vst [vmem:[%s6076_s21 + $0x78] sm:$0xff] %v4474_v43  ;;  %v3372_v6 = vpop.f32.mrb[143].mxu1 }
 0x2f3   : > { %3461 = vst [vmem:[%s6076_s21 + $0x68] sm:$0xff] %v3372_v6 }
 0x2f7   : > { %v4477_v42 = vpop.f32.mrb[144].mxu1 }
 0x2f8   : > { %3466 = vst [vmem:[%s6076_s21 + $0x90] sm:$0xff] %v4477_v42  ;;  %v3385_v55 = vpop.f32.mrb[145].mxu1 }
 0x2f9   : > { %3464 = vst [vmem:[%s6076_s21 + $0x80] sm:$0xff] %v3385_v55  ;;  %v4478_v23 = vpop.f32.mrb[146].mxu1 }
 0x2fa   : > { %3467 = vst [vmem:[%s6076_s21 + $0x98] sm:$0xff] %v4478_v23  ;;  %v3388_v19 = vpop.f32.mrb[147].mxu1 }
 0x2fb   : > { %3465 = vst [vmem:[%s6076_s21 + $0x88] sm:$0xff] %v3388_v19 }
 0x2ff   : > { %v4481_v37 = vpop.f32.mrb[148].mxu1 }
 0x300   : > { %3470 = vst [vmem:[%s6076_s21 + $0xb0] sm:$0xff] %v4481_v37  ;;  %v3401_v14 = vpop.f32.mrb[149].mxu1 }
 0x301   : > { %3468 = vst [vmem:[%s6076_s21 + $0xa0] sm:$0xff] %v3401_v14  ;;  %v4482_v27 = vpop.f32.mrb[150].mxu1 }
 0x302   : > { %3471 = vst [vmem:[%s6076_s21 + $0xb8] sm:$0xff] %v4482_v27  ;;  %v3404_v32 = vpop.f32.mrb[151].mxu1 }
 0x303   : > { %3469 = vst [vmem:[%s6076_s21 + $0xa8] sm:$0xff] %v3404_v32 }
 0x307   : > { %v4485_v45 = vpop.f32.mrb[152].mxu1 }
 0x308   : > { %3474 = vst [vmem:[%s6076_s21 + $0xd0] sm:$0xff] %v4485_v45  ;;  %v3417_v2 = vpop.f32.mrb[153].mxu1 }
 0x309   : > { %3472 = vst [vmem:[%s6076_s21 + $0xc0] sm:$0xff] %v3417_v2  ;;  %v4486_v7 = vpop.f32.mrb[154].mxu1 }
 0x30a   : > { %3475 = vst [vmem:[%s6076_s21 + $0xd8] sm:$0xff] %v4486_v7  ;;  %v3420_v41 = vpop.f32.mrb[155].mxu1 }
 0x30b   : > { %3473 = vst [vmem:[%s6076_s21 + $0xc8] sm:$0xff] %v3420_v41 }
 0x30f   : > { %v4489_v24 = vpop.f32.mrb[156].mxu1 }
 0x310   : > { %3478 = vst [vmem:[%s6076_s21 + $0xf0] sm:$0xff] %v4489_v24  ;;  %v3433_v57 = vpop.f32.mrb[157].mxu1 }
 0x311   : > { %3476 = vst [vmem:[%s6076_s21 + $0xe0] sm:$0xff] %v3433_v57  ;;  %v4490_v15 = vpop.f32.mrb[158].mxu1 }
 0x312   : > { %3479 = vst [vmem:[%s6076_s21 + $0xf8] sm:$0xff] %v4490_v15  ;;  %v3436_v59 = vpop.f32.mrb[159].mxu1 }
 0x313   : > { %3477 = vst [vmem:[%s6076_s21 + $0xe8] sm:$0xff] %v3436_v59 }
 0x314 PF: > { %s14_s15 = sadd.s32 1, %s4747_s15  }
 0x315   : > { %p11_p4 = scmp.ge.s32.totalorder %s14_s15, 4  }
 0x317   :  { %13 = sbr.rel (!%p11_p4) target bundleno = 1 (0x1), region = 68 }

</bundles_post_ra>
